<compile_context>
chip_gen: v7x
topology: tpu7x:2x2x1
jax: 0.10.0
libtpu: 0.0.40
codegen_flags: <defaults>
</compile_context>

<pallas_src>
import jax
import jax.numpy as jnp
from jax import lax
from jax.experimental import pallas as pl
from jax.experimental.pallas import tpu as pltpu

# ----------------------------- hyper-parameters ------------------------------
B = 2              # batch
S = 16             # sequence length
H = 32             # bert_hidden_size
HEAD_HIDDEN = 16   # args.head_hidden_size
LIN_HIDDEN = 16    # args.linear_hidden_size
NUM_OUT = 3        # args.num_output
VOCAB = 64
EPS = 1e-5         # nn.LayerNorm default eps
OUT_PAD = 128      # lane-dense padded width for the concat-linear / classifier

BS = B * S
V = VOCAB
VB = V + 8 * H     # row where the 9 bias/gamma/beta vectors start in the whv slab
CW = 2 * H + 1     # row where the padded classifier weight starts in the wlcls slab

# ----------------------------- shared math helpers ---------------------------
_ERF_P = 0.3275911
_ERF_A = (0.254829592, -0.284496736, 1.421413741, -1.453152027, 1.061405429)


def _erf(x):
    # Abramowitz & Stegun 7.1.26 rational approximation, |err| <= 1.5e-7.
    # Kept (instead of lax.erf) because it is proven to lower cleanly in Mosaic and
    # keeps the composed GELU well inside the 1e-3 reference check; exp goes to EUP.
    sgn = jnp.where(x >= 0.0, 1.0, -1.0)
    a = jnp.abs(x)
    t = 1.0 / (1.0 + _ERF_P * a)
    a1, a2, a3, a4, a5 = _ERF_A
    poly = t * (a1 + t * (a2 + t * (a3 + t * (a4 + t * a5))))
    return sgn * (1.0 - poly * jnp.exp(-a * a))


def _gelu(x):
    # nn.GELU() default = exact erf formulation
    return 0.5 * x * (1.0 + _erf(x * 0.7071067811865476))


def _layernorm(x, gamma, beta):
    mu = jnp.mean(x, axis=-1, keepdims=True)
    var = jnp.mean((x - mu) ** 2, axis=-1, keepdims=True)
    return (x - mu) * lax.rsqrt(var + EPS) * gamma + beta


# ----------------------------- fused Pallas kernel ---------------------------
# slab layouts (see pack_params):
#   whv (V+8H+9, H): [0:V) emb_table | [V:V+H) w_enc | [V+H:V+2H) w1p | [V+2H:V+8H) w1e
#                    | [VB:VB+9) b_enc, g_enc, be_enc, b1p, g1p, be1p, b1e, g1e, be1e
#   wlcls (2H+1+128+1, 128): [0:H) w2p@wl[:HH] pad | [H:2H) w2e@wl[HH:] pad
#                    | [2H] folded bias pad | [CW:CW+128) classifier W pad | [CW+128] classifier b pad
def fused_kernel(off_ref, tok_ref, whv_ref, wl_ref, out_ref):
    f32 = jnp.float32

    # ---- token embedding lookup: one-hot(tokens) @ emb_table on the MXU ----
    tok = tok_ref[...]                                                   # (BS, 1) int32
    onehot = (lax.broadcasted_iota(jnp.int32, (BS, V), 1) == tok).astype(f32)
    emb = jnp.dot(onehot, whv_ref[0:V, :], preferred_element_type=f32)   # (BS, H)

    # ---- encoder stand-in: Linear + LayerNorm + GELU -> "last_hidden_state" ----
    # TODO(synk): pretrained 12-layer BertModel (checkpoint weights + attention over
    # the (x > 0) mask) has no in-script equivalent; substituted by this single
    # deterministic encoder layer.
    h = (jnp.dot(emb, whv_ref[V:V + H, :], preferred_element_type=f32)
         + whv_ref[VB:VB + 1, :])
    hid = _gelu(_layernorm(h, whv_ref[VB + 1:VB + 2, :], whv_ref[VB + 2:VB + 3, :]))  # (BS, H)

    # ---- _retrieve_pron_and_ent_embeddings as ONE selector matmul ----
    # row ordering is piece-major: piece p of batch b sits at row p*B + b with
    # pieces = [pron, A_start, A_end-1, A_mean, B_start, B_end-1, B_mean].
    row = lax.broadcasted_iota(jnp.int32, (7 * B, BS), 0)
    col = lax.broadcasted_iota(jnp.int32, (7 * B, BS), 1)
    sel = jnp.zeros((7 * B, BS), f32)
    for b in range(B):                                  # static unroll, B = 2
        sa = off_ref[b, 0]
        ea = off_ref[b, 1]
        sb = off_ref[b, 2]
        eb = off_ref[b, 3]
        po = off_ref[b, 4]
        inv_a = 1.0 / (ea - sa).astype(f32)
        inv_b = 1.0 / (eb - sb).astype(f32)
        c = col - b * S                                 # in-batch column index
        sel = sel + jnp.where((row == 0 * B + b) & (c == po), 1.0, 0.0)
        sel = sel + jnp.where((row == 1 * B + b) & (c == sa), 1.0, 0.0)
        sel = sel + jnp.where((row == 2 * B + b) & (c == ea - 1), 1.0, 0.0)
        sel = sel + jnp.where((row == 3 * B + b) & (c >= sa) & (c < ea), inv_a, 0.0)
        sel = sel + jnp.where((row == 4 * B + b) & (c == sb), 1.0, 0.0)
        sel = sel + jnp.where((row == 5 * B + b) & (c == eb - 1), 1.0, 0.0)
        sel = sel + jnp.where((row == 6 * B + b) & (c >= sb) & (c < eb), inv_b, 0.0)
    g = jnp.dot(sel, hid, preferred_element_type=f32)                    # (7B, H)

    pron = g[0:B, :]                                                     # (B, H)

    # ---- Entity_Resolution_Head ----
    # ffnn_pronoun first block: Linear -> LayerNorm -> GELU (-> Dropout=id)
    hp = (jnp.dot(pron, whv_ref[V + H:V + 2 * H, :], preferred_element_type=f32)
          + whv_ref[VB + 3:VB + 4, :])
    hp = _gelu(_layernorm(hp, whv_ref[VB + 4:VB + 5, :], whv_ref[VB + 5:VB + 6, :]))

    # ffnn_entities first block: ent @ w1e == sum_k piece_k @ w1e[kH:(k+1)H]
    he = jnp.dot(g[B:2 * B, :], whv_ref[V + 2 * H:V + 3 * H, :],
                 preferred_element_type=f32)
    for k in range(1, 6):
        wk = whv_ref[V + 2 * H + k * H:V + 2 * H + (k + 1) * H, :]
        he = he + jnp.dot(g[(k + 1) * B:(k + 2) * B, :], wk, preferred_element_type=f32)
    he = he + whv_ref[VB + 6:VB + 7, :]
    he = _gelu(_layernorm(he, whv_ref[VB + 7:VB + 8, :], whv_ref[VB + 8:VB + 9, :]))

    # folded: linear(cat([ffnn2_p(hp), ffnn2_e(he)])) == hp@(w2p@wlp) + he@(w2e@wle) + bl'
    x = (jnp.dot(hp, wl_ref[0:H, :], preferred_element_type=f32)
         + jnp.dot(he, wl_ref[H:2 * H, :], preferred_element_type=f32)
         + wl_ref[2 * H:2 * H + 1, :])
    x = _gelu(x)                                       # (B, 128); padded lanes stay 0; dropout = id

    # classifier, lane-dense (128-wide zero-padded) output store
    out_ref[...] = (jnp.dot(x, wl_ref[CW:CW + OUT_PAD, :], preferred_element_type=f32)
                    + wl_ref[CW + OUT_PAD:CW + OUT_PAD + 1, :])          # (B, 128)


# ----------------------------- parameter packing -----------------------------
def pack_params(params):
    (w1p, b1p, g1p, be1p, w2p, b2p,
     w1e, b1e, g1e, be1e, w2e, b2e, wl, bl, wc, bc) = params['head']
    hi = lax.Precision.HIGHEST

    # fold the (linear) ffnn second layers into the concat-linear
    wlp, wle = wl[:HEAD_HIDDEN], wl[HEAD_HIDDEN:]
    w2lp = jnp.dot(w2p, wlp, precision=hi)                    # (H, LIN)
    w2le = jnp.dot(w2e, wle, precision=hi)                    # (H, LIN)
    bl_fold = bl + jnp.dot(b2p, wlp, precision=hi) + jnp.dot(b2e, wle, precision=hi)

    # 32-lane slab: all H-wide matrices + all bias/gamma/beta rows
    whv = jnp.concatenate(
        [params['emb_table'], params['w_enc'], w1p, w1e,
         params['b_enc'], params['g_enc'], params['be_enc'],
         b1p, g1p, be1p, b1e, g1e, be1e], axis=0)             # (V+8H+9, H) = (329, 32)

    # 128-lane slab: folded concat-linear (padded) + padded classifier
    def pad128(a):
        return jnp.pad(a, ((0, 0), (0, OUT_PAD - a.shape[1])))

    wcls_w = jnp.zeros((OUT_PAD, OUT_PAD), jnp.float32).at[:LIN_HIDDEN, :NUM_OUT].set(wc)
    wcls_b = jnp.zeros((1, OUT_PAD), jnp.float32).at[:, :NUM_OUT].set(bc)
    wlcls = jnp.concatenate(
        [pad128(w2lp), pad128(w2le), pad128(bl_fold), wcls_w, wcls_b], axis=0)  # (194, 128)
    return whv, wlcls


# ----------------------------- model forward ---------------------------------
@jax.jit
def cr_model_forward(packed, features, offsets):
    whv, wlcls = packed
    out_pad = pl.pallas_call(
        fused_kernel,
        out_shape=jax.ShapeDtypeStruct((B, OUT_PAD), jnp.float32),
        grid_spec=pltpu.PrefetchScalarGridSpec(
            num_scalar_prefetch=1,                 # offsets -> SMEM
            grid=(1,),                             # whole batch in ONE step (launch-bound kernel)
            in_specs=[
                pl.BlockSpec((BS, 1), lambda i, off: (0, 0)),        # token ids
                pl.BlockSpec(whv.shape, lambda i, off: (0, 0)),      # 32-lane weight/bias slab
                pl.BlockSpec(wlcls.shape, lambda i, off: (0, 0)),    # 128-lane linear+classifier slab
            ],
            out_specs=pl.BlockSpec((B, OUT_PAD), lambda i, off: (0, 0)),
        ),
        compiler_params=pltpu.CompilerParams(dimension_semantics=("arbitrary",)),
    )(offsets, features.reshape(BS, 1), whv, wlcls)
    return out_pad[:, :NUM_OUT]


# ----------------------------- pure-JAX reference ----------------------------
def reference_forward(params, features, offsets):
    hi = lax.Precision.HIGHEST
    emb = params['emb_table'][features]
    h = jnp.dot(emb, params['w_enc'], precision=hi) + params['b_enc']
    hid = _gelu(_layernorm(h, params['g_enc'], params['be_enc']))

    prons, ents = [], []
    for bi in range(features.shape[0]):
        e = hid[bi]
        sa, ea, sb, eb, po = [int(offsets[bi, j]) for j in range(5)]
        emb_a = jnp.concatenate([e[sa], e[ea - 1], e[sa:ea].mean(axis=0)], axis=-1)
        emb_b = jnp.concatenate([e[sb], e[eb - 1], e[sb:eb].mean(axis=0)], axis=-1)
        ents.append(jnp.concatenate([emb_a, emb_b], axis=-1))
        prons.append(e[po])
    pron = jnp.stack(prons, axis=0)
    ent = jnp.stack(ents, axis=0)

    (w1p, b1p, g1p, be1p, w2p, b2p,
     w1e, b1e, g1e, be1e, w2e, b2e, wl, bl, wc, bc) = params['head']

    def ffnn(x, w1, b1, g, be, w2, b2):
        h1 = jnp.dot(x, w1, precision=hi) + b1
        h1 = _gelu(_layernorm(h1, g, be))
        return jnp.dot(h1, w2, precision=hi) + b2

    xp = ffnn(pron, w1p, b1p, g1p, be1p, w2p, b2p)
    xe = ffnn(ent, w1e, b1e, g1e, be1e, w2e, b2e)
    x = jnp.dot(jnp.concatenate([xp, xe], axis=-1), wl, precision=hi) + bl
    x = _gelu(x)
    return jnp.dot(x, wc, precision=hi) + bc


# ----------------------------- parameter init --------------------------------
def init_params(key):
    ks = jax.random.split(key, 16)

    def w(k, i, o, s=0.05):
        return jax.random.normal(k, (i, o), jnp.float32) * s

    def b(k, o, s=0.01):
        return jax.random.normal(k, (1, o), jnp.float32) * s

    return {
        'emb_table': jax.random.normal(ks[0], (VOCAB, H), jnp.float32) * 0.5,
        'w_enc': w(ks[1], H, H),
        'b_enc': b(ks[2], H),
        'g_enc': jnp.ones((1, H), jnp.float32),
        'be_enc': jnp.zeros((1, H), jnp.float32),
        'head': (
            w(ks[3], H, H), b(ks[4], H),                      # ffnn_pronoun linear1
            jnp.ones((1, H), jnp.float32), jnp.zeros((1, H), jnp.float32),
            w(ks[5], H, HEAD_HIDDEN), b(ks[6], HEAD_HIDDEN),  # ffnn_pronoun linear2
            w(ks[7], 6 * H, H), b(ks[8], H),                  # ffnn_entities linear1
            jnp.ones((1, H), jnp.float32), jnp.zeros((1, H), jnp.float32),
            w(ks[9], H, HEAD_HIDDEN), b(ks[10], HEAD_HIDDEN), # ffnn_entities linear2
            w(ks[11], 2 * HEAD_HIDDEN, LIN_HIDDEN), b(ks[12], LIN_HIDDEN),  # self.linear
            w(ks[13], LIN_HIDDEN, NUM_OUT), b(ks[14], NUM_OUT),             # classifier
        ),
    }


# ----------------------------- main -------------------------------------------
if __name__ == "__main__":
    key = jax.random.PRNGKey(0)
    pkey, fkey = jax.random.split(key)
    params = init_params(pkey)
    packed = pack_params(params)

    # sample = {'features': token ids, 'offsets': [start_A, end_A, start_B, end_B, pron_off]}
    # precondition (as in the dataset): 0 <= offsets < S, end_A > start_A, end_B > start_B.
    features = jax.random.randint(fkey, (B, S), 1, VOCAB, dtype=jnp.int32)
    offsets = jnp.array([[1, 4, 6, 9, 12],
                         [2, 5, 7, 10, 14]], dtype=jnp.int32)

    out = cr_model_forward(packed, features, offsets)
    out = jax.block_until_ready(out)

    ref = reference_forward(params, features, offsets)
    assert out.shape == (B, NUM_OUT), out.shape
    assert bool(jnp.all(jnp.isfinite(out)))
    assert jnp.allclose(out, ref, atol=1e-3, rtol=1e-3), (out, ref)
    print("KERNEL_OK")
</pallas_src>

<mosaic_0001>
module attributes {stable_mosaic.version = 11 : i64} {
  func.func @fused_kernel(%arg0: i32, %arg1: memref<2x5xi32, #tpu.memory_space<smem>>, %arg2: memref<32x1xi32, #tpu.memory_space<vmem>>, %arg3: memref<329x32xf32, #tpu.memory_space<vmem>>, %arg4: memref<194x128xf32, #tpu.memory_space<vmem>>, %arg5: memref<2x128xf32, #tpu.memory_space<vmem>>) attributes {dimension_semantics = [#tpu.dimension_semantics<arbitrary>], iteration_bounds = array<i64: 1>, scalar_prefetch = 1 : i64, scratch_operands = 0 : i64, tpu.core_type = #tpu.core_type<tc>, window_params = [{pipeline_mode = #tpu.pipeline_mode<synchronous>, transform_indices = @transform_0, window_bounds = array<i64: 32, 1>}, {pipeline_mode = #tpu.pipeline_mode<synchronous>, transform_indices = @transform_1, window_bounds = array<i64: 329, 32>}, {pipeline_mode = #tpu.pipeline_mode<synchronous>, transform_indices = @transform_2, window_bounds = array<i64: 194, 128>}, {pipeline_mode = #tpu.pipeline_mode<synchronous>, transform_indices = @transform_3, window_bounds = array<i64: 2, 128>}]} {
    %c0 = arith.constant 0 : index
    %c0_0 = arith.constant 0 : index
    %0 = vector.load %arg2[%c0, %c0_0] : memref<32x1xi32, #tpu.memory_space<vmem>>, vector<32x1xi32>
    %1 = tpu.iota {dimensions = array<i32: 1>} : vector<32x64xi32>
    %2 = vector.broadcast %0 : vector<32x1xi32> to vector<32x64xi32>
    %3 = arith.cmpi eq, %1, %2 : vector<32x64xi32>
    %4 = arith.extui %3 : vector<32x64xi1> to vector<32x64xi32>
    %5 = arith.sitofp %4 : vector<32x64xi32> to vector<32x64xf32>
    %c0_1 = arith.constant 0 : index
    %c0_2 = arith.constant 0 : index
    %6 = vector.load %arg3[%c0_1, %c0_2] : memref<329x32xf32, #tpu.memory_space<vmem>>, vector<64x32xf32>
    %cst = arith.constant dense<0.000000e+00> : vector<32x32xf32>
    %7 = tpu.matmul %5, %6, %cst {dimension_numbers = #tpu.dot_dimension_numbers<[1], [0], [0], [1], [0, 0, 1, 1], [], []>} : vector<32x64xf32>, vector<64x32xf32>, vector<32x32xf32> -> vector<32x32xf32>
    %c64 = arith.constant 64 : index
    %c0_3 = arith.constant 0 : index
    %8 = vector.load %arg3[%c64, %c0_3] : memref<329x32xf32, #tpu.memory_space<vmem>>, vector<32x32xf32>
    %cst_4 = arith.constant dense<0.000000e+00> : vector<32x32xf32>
    %9 = tpu.matmul %7, %8, %cst_4 {dimension_numbers = #tpu.dot_dimension_numbers<[1], [0], [0], [1], [0, 0, 1, 1], [], []>} : vector<32x32xf32>, vector<32x32xf32>, vector<32x32xf32> -> vector<32x32xf32>
    %c320 = arith.constant 320 : index
    %c0_5 = arith.constant 0 : index
    %10 = vector.load %arg3[%c320, %c0_5] : memref<329x32xf32, #tpu.memory_space<vmem>>, vector<1x32xf32>
    %11 = vector.broadcast %10 : vector<1x32xf32> to vector<32x32xf32>
    %12 = arith.addf %9, %11 : vector<32x32xf32>
    %c321 = arith.constant 321 : index
    %c0_6 = arith.constant 0 : index
    %13 = vector.load %arg3[%c321, %c0_6] : memref<329x32xf32, #tpu.memory_space<vmem>>, vector<1x32xf32>
    %c322 = arith.constant 322 : index
    %c0_7 = arith.constant 0 : index
    %14 = vector.load %arg3[%c322, %c0_7] : memref<329x32xf32, #tpu.memory_space<vmem>>, vector<1x32xf32>
    %cst_8 = arith.constant dense<0.000000e+00> : vector<32xf32>
    %15 = vector.multi_reduction <add>, %12, %cst_8 [1] : vector<32x32xf32> to vector<32xf32>
    %16 = vector.shape_cast %15 : vector<32xf32> to vector<32x1xf32>
    %cst_9 = arith.constant 3.200000e+01 : f32
    %17 = vector.broadcast %cst_9 : f32 to vector<32x1xf32>
    %18 = arith.divf %16, %17 : vector<32x1xf32>
    %19 = vector.broadcast %18 : vector<32x1xf32> to vector<32x32xf32>
    %20 = arith.subf %12, %19 : vector<32x32xf32>
    %21 = arith.mulf %20, %20 : vector<32x32xf32>
    %cst_10 = arith.constant dense<0.000000e+00> : vector<32xf32>
    %22 = vector.multi_reduction <add>, %21, %cst_10 [1] : vector<32x32xf32> to vector<32xf32>
    %23 = vector.shape_cast %22 : vector<32xf32> to vector<32x1xf32>
    %cst_11 = arith.constant 3.200000e+01 : f32
    %24 = vector.broadcast %cst_11 : f32 to vector<32x1xf32>
    %25 = arith.divf %23, %24 : vector<32x1xf32>
    %26 = vector.broadcast %18 : vector<32x1xf32> to vector<32x32xf32>
    %27 = arith.subf %12, %26 : vector<32x32xf32>
    %cst_12 = arith.constant 9.99999974E-6 : f32
    %28 = vector.broadcast %cst_12 : f32 to vector<32x1xf32>
    %29 = arith.addf %25, %28 : vector<32x1xf32>
    %30 = math.rsqrt %29 : vector<32x1xf32>
    %31 = vector.broadcast %30 : vector<32x1xf32> to vector<32x32xf32>
    %32 = arith.mulf %27, %31 : vector<32x32xf32>
    %33 = vector.broadcast %13 : vector<1x32xf32> to vector<32x32xf32>
    %34 = arith.mulf %32, %33 : vector<32x32xf32>
    %35 = vector.broadcast %14 : vector<1x32xf32> to vector<32x32xf32>
    %36 = arith.addf %34, %35 : vector<32x32xf32>
    %cst_13 = arith.constant 5.000000e-01 : f32
    %37 = vector.broadcast %cst_13 : f32 to vector<32x32xf32>
    %38 = arith.mulf %37, %36 : vector<32x32xf32>
    %cst_14 = arith.constant 0.707106769 : f32
    %39 = vector.broadcast %cst_14 : f32 to vector<32x32xf32>
    %40 = arith.mulf %36, %39 : vector<32x32xf32>
    %cst_15 = arith.constant 0.000000e+00 : f32
    %41 = vector.broadcast %cst_15 : f32 to vector<32x32xf32>
    %42 = arith.cmpf oge, %40, %41 : vector<32x32xf32>
    %cst_16 = arith.constant 1.000000e+00 : f32
    %cst_17 = arith.constant -1.000000e+00 : f32
    %43 = vector.broadcast %cst_16 : f32 to vector<32x32xf32>
    %44 = vector.broadcast %cst_17 : f32 to vector<32x32xf32>
    %45 = arith.select %42, %43, %44 : vector<32x32xi1>, vector<32x32xf32>
    %46 = math.absf %40 : vector<32x32xf32>
    %cst_18 = arith.constant 0.327591091 : f32
    %47 = vector.broadcast %cst_18 : f32 to vector<32x32xf32>
    %48 = arith.mulf %47, %46 : vector<32x32xf32>
    %cst_19 = arith.constant 1.000000e+00 : f32
    %49 = vector.broadcast %cst_19 : f32 to vector<32x32xf32>
    %50 = arith.addf %49, %48 : vector<32x32xf32>
    %cst_20 = arith.constant 1.000000e+00 : f32
    %51 = vector.broadcast %cst_20 : f32 to vector<32x32xf32>
    %52 = arith.divf %51, %50 : vector<32x32xf32>
    %cst_21 = arith.constant 1.06140542 : f32
    %53 = vector.broadcast %cst_21 : f32 to vector<32x32xf32>
    %54 = arith.mulf %52, %53 : vector<32x32xf32>
    %cst_22 = arith.constant -1.45315206 : f32
    %55 = vector.broadcast %cst_22 : f32 to vector<32x32xf32>
    %56 = arith.addf %55, %54 : vector<32x32xf32>
    %57 = arith.mulf %52, %56 : vector<32x32xf32>
    %cst_23 = arith.constant 1.42141378 : f32
    %58 = vector.broadcast %cst_23 : f32 to vector<32x32xf32>
    %59 = arith.addf %58, %57 : vector<32x32xf32>
    %60 = arith.mulf %52, %59 : vector<32x32xf32>
    %cst_24 = arith.constant -0.284496725 : f32
    %61 = vector.broadcast %cst_24 : f32 to vector<32x32xf32>
    %62 = arith.addf %61, %60 : vector<32x32xf32>
    %63 = arith.mulf %52, %62 : vector<32x32xf32>
    %cst_25 = arith.constant 0.254829586 : f32
    %64 = vector.broadcast %cst_25 : f32 to vector<32x32xf32>
    %65 = arith.addf %64, %63 : vector<32x32xf32>
    %66 = arith.mulf %52, %65 : vector<32x32xf32>
    %cst_26 = arith.constant 0.000000e+00 : f32
    %67 = vector.broadcast %cst_26 : f32 to vector<32x32xf32>
    %68 = arith.subf %67, %46 : vector<32x32xf32>
    %69 = arith.mulf %68, %46 : vector<32x32xf32>
    %70 = math.exp %69 : vector<32x32xf32>
    %71 = arith.mulf %66, %70 : vector<32x32xf32>
    %cst_27 = arith.constant 1.000000e+00 : f32
    %72 = vector.broadcast %cst_27 : f32 to vector<32x32xf32>
    %73 = arith.subf %72, %71 : vector<32x32xf32>
    %74 = arith.mulf %45, %73 : vector<32x32xf32>
    %cst_28 = arith.constant 1.000000e+00 : f32
    %75 = vector.broadcast %cst_28 : f32 to vector<32x32xf32>
    %76 = arith.addf %75, %74 : vector<32x32xf32>
    %77 = arith.mulf %38, %76 : vector<32x32xf32>
    %78 = tpu.iota {dimensions = array<i32: 0>} : vector<14x32xi32>
    %79 = tpu.iota {dimensions = array<i32: 1>} : vector<14x32xi32>
    %cst_29 = arith.constant 0.000000e+00 : f32
    %80 = vector.broadcast %cst_29 : f32 to vector<14x32xf32>
    %c0_30 = arith.constant 0 : index
    %c0_31 = arith.constant 0 : index
    %81 = memref.load %arg1[%c0_30, %c0_31] : memref<2x5xi32, #tpu.memory_space<smem>>
    %c0_32 = arith.constant 0 : index
    %c1 = arith.constant 1 : index
    %82 = memref.load %arg1[%c0_32, %c1] : memref<2x5xi32, #tpu.memory_space<smem>>
    %c0_33 = arith.constant 0 : index
    %c2 = arith.constant 2 : index
    %83 = memref.load %arg1[%c0_33, %c2] : memref<2x5xi32, #tpu.memory_space<smem>>
    %c0_34 = arith.constant 0 : index
    %c3 = arith.constant 3 : index
    %84 = memref.load %arg1[%c0_34, %c3] : memref<2x5xi32, #tpu.memory_space<smem>>
    %c0_35 = arith.constant 0 : index
    %c4 = arith.constant 4 : index
    %85 = memref.load %arg1[%c0_35, %c4] : memref<2x5xi32, #tpu.memory_space<smem>>
    %86 = arith.subi %82, %81 : i32
    %87 = arith.sitofp %86 : i32 to f32
    %cst_36 = arith.constant 1.000000e+00 : f32
    %88 = arith.divf %cst_36, %87 : f32
    %89 = arith.subi %84, %83 : i32
    %90 = arith.sitofp %89 : i32 to f32
    %cst_37 = arith.constant 1.000000e+00 : f32
    %91 = arith.divf %cst_37, %90 : f32
    %c0_i32 = arith.constant 0 : i32
    %92 = vector.broadcast %c0_i32 : i32 to vector<14x32xi32>
    %93 = arith.subi %79, %92 : vector<14x32xi32>
    %c0_i32_38 = arith.constant 0 : i32
    %94 = vector.broadcast %c0_i32_38 : i32 to vector<14x32xi32>
    %95 = arith.cmpi eq, %78, %94 : vector<14x32xi32>
    %96 = vector.broadcast %85 : i32 to vector<14x32xi32>
    %97 = arith.cmpi eq, %93, %96 : vector<14x32xi32>
    %98 = arith.andi %95, %97 : vector<14x32xi1>
    %cst_39 = arith.constant 1.000000e+00 : f32
    %cst_40 = arith.constant 0.000000e+00 : f32
    %99 = vector.broadcast %cst_39 : f32 to vector<14x32xf32>
    %100 = vector.broadcast %cst_40 : f32 to vector<14x32xf32>
    %101 = arith.select %98, %99, %100 : vector<14x32xi1>, vector<14x32xf32>
    %102 = arith.addf %80, %101 : vector<14x32xf32>
    %c2_i32 = arith.constant 2 : i32
    %103 = vector.broadcast %c2_i32 : i32 to vector<14x32xi32>
    %104 = arith.cmpi eq, %78, %103 : vector<14x32xi32>
    %105 = vector.broadcast %81 : i32 to vector<14x32xi32>
    %106 = arith.cmpi eq, %93, %105 : vector<14x32xi32>
    %107 = arith.andi %104, %106 : vector<14x32xi1>
    %cst_41 = arith.constant 1.000000e+00 : f32
    %cst_42 = arith.constant 0.000000e+00 : f32
    %108 = vector.broadcast %cst_41 : f32 to vector<14x32xf32>
    %109 = vector.broadcast %cst_42 : f32 to vector<14x32xf32>
    %110 = arith.select %107, %108, %109 : vector<14x32xi1>, vector<14x32xf32>
    %111 = arith.addf %102, %110 : vector<14x32xf32>
    %c4_i32 = arith.constant 4 : i32
    %112 = vector.broadcast %c4_i32 : i32 to vector<14x32xi32>
    %113 = arith.cmpi eq, %78, %112 : vector<14x32xi32>
    %c1_i32 = arith.constant 1 : i32
    %114 = arith.subi %82, %c1_i32 : i32
    %115 = vector.broadcast %114 : i32 to vector<14x32xi32>
    %116 = arith.cmpi eq, %93, %115 : vector<14x32xi32>
    %117 = arith.andi %113, %116 : vector<14x32xi1>
    %cst_43 = arith.constant 1.000000e+00 : f32
    %cst_44 = arith.constant 0.000000e+00 : f32
    %118 = vector.broadcast %cst_43 : f32 to vector<14x32xf32>
    %119 = vector.broadcast %cst_44 : f32 to vector<14x32xf32>
    %120 = arith.select %117, %118, %119 : vector<14x32xi1>, vector<14x32xf32>
    %121 = arith.addf %111, %120 : vector<14x32xf32>
    %c6_i32 = arith.constant 6 : i32
    %122 = vector.broadcast %c6_i32 : i32 to vector<14x32xi32>
    %123 = arith.cmpi eq, %78, %122 : vector<14x32xi32>
    %124 = vector.broadcast %81 : i32 to vector<14x32xi32>
    %125 = arith.cmpi sge, %93, %124 : vector<14x32xi32>
    %126 = arith.andi %123, %125 : vector<14x32xi1>
    %127 = vector.broadcast %82 : i32 to vector<14x32xi32>
    %128 = arith.cmpi slt, %93, %127 : vector<14x32xi32>
    %129 = arith.andi %126, %128 : vector<14x32xi1>
    %cst_45 = arith.constant 0.000000e+00 : f32
    %130 = vector.broadcast %88 : f32 to vector<14x32xf32>
    %131 = vector.broadcast %cst_45 : f32 to vector<14x32xf32>
    %132 = arith.select %129, %130, %131 : vector<14x32xi1>, vector<14x32xf32>
    %133 = arith.addf %121, %132 : vector<14x32xf32>
    %c8_i32 = arith.constant 8 : i32
    %134 = vector.broadcast %c8_i32 : i32 to vector<14x32xi32>
    %135 = arith.cmpi eq, %78, %134 : vector<14x32xi32>
    %136 = vector.broadcast %83 : i32 to vector<14x32xi32>
    %137 = arith.cmpi eq, %93, %136 : vector<14x32xi32>
    %138 = arith.andi %135, %137 : vector<14x32xi1>
    %cst_46 = arith.constant 1.000000e+00 : f32
    %cst_47 = arith.constant 0.000000e+00 : f32
    %139 = vector.broadcast %cst_46 : f32 to vector<14x32xf32>
    %140 = vector.broadcast %cst_47 : f32 to vector<14x32xf32>
    %141 = arith.select %138, %139, %140 : vector<14x32xi1>, vector<14x32xf32>
    %142 = arith.addf %133, %141 : vector<14x32xf32>
    %c10_i32 = arith.constant 10 : i32
    %143 = vector.broadcast %c10_i32 : i32 to vector<14x32xi32>
    %144 = arith.cmpi eq, %78, %143 : vector<14x32xi32>
    %c1_i32_48 = arith.constant 1 : i32
    %145 = arith.subi %84, %c1_i32_48 : i32
    %146 = vector.broadcast %145 : i32 to vector<14x32xi32>
    %147 = arith.cmpi eq, %93, %146 : vector<14x32xi32>
    %148 = arith.andi %144, %147 : vector<14x32xi1>
    %cst_49 = arith.constant 1.000000e+00 : f32
    %cst_50 = arith.constant 0.000000e+00 : f32
    %149 = vector.broadcast %cst_49 : f32 to vector<14x32xf32>
    %150 = vector.broadcast %cst_50 : f32 to vector<14x32xf32>
    %151 = arith.select %148, %149, %150 : vector<14x32xi1>, vector<14x32xf32>
    %152 = arith.addf %142, %151 : vector<14x32xf32>
    %c12_i32 = arith.constant 12 : i32
    %153 = vector.broadcast %c12_i32 : i32 to vector<14x32xi32>
    %154 = arith.cmpi eq, %78, %153 : vector<14x32xi32>
    %155 = vector.broadcast %83 : i32 to vector<14x32xi32>
    %156 = arith.cmpi sge, %93, %155 : vector<14x32xi32>
    %157 = arith.andi %154, %156 : vector<14x32xi1>
    %158 = vector.broadcast %84 : i32 to vector<14x32xi32>
    %159 = arith.cmpi slt, %93, %158 : vector<14x32xi32>
    %160 = arith.andi %157, %159 : vector<14x32xi1>
    %cst_51 = arith.constant 0.000000e+00 : f32
    %161 = vector.broadcast %91 : f32 to vector<14x32xf32>
    %162 = vector.broadcast %cst_51 : f32 to vector<14x32xf32>
    %163 = arith.select %160, %161, %162 : vector<14x32xi1>, vector<14x32xf32>
    %164 = arith.addf %152, %163 : vector<14x32xf32>
    %c1_52 = arith.constant 1 : index
    %c0_53 = arith.constant 0 : index
    %165 = memref.load %arg1[%c1_52, %c0_53] : memref<2x5xi32, #tpu.memory_space<smem>>
    %c1_54 = arith.constant 1 : index
    %c1_55 = arith.constant 1 : index
    %166 = memref.load %arg1[%c1_54, %c1_55] : memref<2x5xi32, #tpu.memory_space<smem>>
    %c1_56 = arith.constant 1 : index
    %c2_57 = arith.constant 2 : index
    %167 = memref.load %arg1[%c1_56, %c2_57] : memref<2x5xi32, #tpu.memory_space<smem>>
    %c1_58 = arith.constant 1 : index
    %c3_59 = arith.constant 3 : index
    %168 = memref.load %arg1[%c1_58, %c3_59] : memref<2x5xi32, #tpu.memory_space<smem>>
    %c1_60 = arith.constant 1 : index
    %c4_61 = arith.constant 4 : index
    %169 = memref.load %arg1[%c1_60, %c4_61] : memref<2x5xi32, #tpu.memory_space<smem>>
    %170 = arith.subi %166, %165 : i32
    %171 = arith.sitofp %170 : i32 to f32
    %cst_62 = arith.constant 1.000000e+00 : f32
    %172 = arith.divf %cst_62, %171 : f32
    %173 = arith.subi %168, %167 : i32
    %174 = arith.sitofp %173 : i32 to f32
    %cst_63 = arith.constant 1.000000e+00 : f32
    %175 = arith.divf %cst_63, %174 : f32
    %c16_i32 = arith.constant 16 : i32
    %176 = vector.broadcast %c16_i32 : i32 to vector<14x32xi32>
    %177 = arith.subi %79, %176 : vector<14x32xi32>
    %c1_i32_64 = arith.constant 1 : i32
    %178 = vector.broadcast %c1_i32_64 : i32 to vector<14x32xi32>
    %179 = arith.cmpi eq, %78, %178 : vector<14x32xi32>
    %180 = vector.broadcast %169 : i32 to vector<14x32xi32>
    %181 = arith.cmpi eq, %177, %180 : vector<14x32xi32>
    %182 = arith.andi %179, %181 : vector<14x32xi1>
    %cst_65 = arith.constant 1.000000e+00 : f32
    %cst_66 = arith.constant 0.000000e+00 : f32
    %183 = vector.broadcast %cst_65 : f32 to vector<14x32xf32>
    %184 = vector.broadcast %cst_66 : f32 to vector<14x32xf32>
    %185 = arith.select %182, %183, %184 : vector<14x32xi1>, vector<14x32xf32>
    %186 = arith.addf %164, %185 : vector<14x32xf32>
    %c3_i32 = arith.constant 3 : i32
    %187 = vector.broadcast %c3_i32 : i32 to vector<14x32xi32>
    %188 = arith.cmpi eq, %78, %187 : vector<14x32xi32>
    %189 = vector.broadcast %165 : i32 to vector<14x32xi32>
    %190 = arith.cmpi eq, %177, %189 : vector<14x32xi32>
    %191 = arith.andi %188, %190 : vector<14x32xi1>
    %cst_67 = arith.constant 1.000000e+00 : f32
    %cst_68 = arith.constant 0.000000e+00 : f32
    %192 = vector.broadcast %cst_67 : f32 to vector<14x32xf32>
    %193 = vector.broadcast %cst_68 : f32 to vector<14x32xf32>
    %194 = arith.select %191, %192, %193 : vector<14x32xi1>, vector<14x32xf32>
    %195 = arith.addf %186, %194 : vector<14x32xf32>
    %c5_i32 = arith.constant 5 : i32
    %196 = vector.broadcast %c5_i32 : i32 to vector<14x32xi32>
    %197 = arith.cmpi eq, %78, %196 : vector<14x32xi32>
    %c1_i32_69 = arith.constant 1 : i32
    %198 = arith.subi %166, %c1_i32_69 : i32
    %199 = vector.broadcast %198 : i32 to vector<14x32xi32>
    %200 = arith.cmpi eq, %177, %199 : vector<14x32xi32>
    %201 = arith.andi %197, %200 : vector<14x32xi1>
    %cst_70 = arith.constant 1.000000e+00 : f32
    %cst_71 = arith.constant 0.000000e+00 : f32
    %202 = vector.broadcast %cst_70 : f32 to vector<14x32xf32>
    %203 = vector.broadcast %cst_71 : f32 to vector<14x32xf32>
    %204 = arith.select %201, %202, %203 : vector<14x32xi1>, vector<14x32xf32>
    %205 = arith.addf %195, %204 : vector<14x32xf32>
    %c7_i32 = arith.constant 7 : i32
    %206 = vector.broadcast %c7_i32 : i32 to vector<14x32xi32>
    %207 = arith.cmpi eq, %78, %206 : vector<14x32xi32>
    %208 = vector.broadcast %165 : i32 to vector<14x32xi32>
    %209 = arith.cmpi sge, %177, %208 : vector<14x32xi32>
    %210 = arith.andi %207, %209 : vector<14x32xi1>
    %211 = vector.broadcast %166 : i32 to vector<14x32xi32>
    %212 = arith.cmpi slt, %177, %211 : vector<14x32xi32>
    %213 = arith.andi %210, %212 : vector<14x32xi1>
    %cst_72 = arith.constant 0.000000e+00 : f32
    %214 = vector.broadcast %172 : f32 to vector<14x32xf32>
    %215 = vector.broadcast %cst_72 : f32 to vector<14x32xf32>
    %216 = arith.select %213, %214, %215 : vector<14x32xi1>, vector<14x32xf32>
    %217 = arith.addf %205, %216 : vector<14x32xf32>
    %c9_i32 = arith.constant 9 : i32
    %218 = vector.broadcast %c9_i32 : i32 to vector<14x32xi32>
    %219 = arith.cmpi eq, %78, %218 : vector<14x32xi32>
    %220 = vector.broadcast %167 : i32 to vector<14x32xi32>
    %221 = arith.cmpi eq, %177, %220 : vector<14x32xi32>
    %222 = arith.andi %219, %221 : vector<14x32xi1>
    %cst_73 = arith.constant 1.000000e+00 : f32
    %cst_74 = arith.constant 0.000000e+00 : f32
    %223 = vector.broadcast %cst_73 : f32 to vector<14x32xf32>
    %224 = vector.broadcast %cst_74 : f32 to vector<14x32xf32>
    %225 = arith.select %222, %223, %224 : vector<14x32xi1>, vector<14x32xf32>
    %226 = arith.addf %217, %225 : vector<14x32xf32>
    %c11_i32 = arith.constant 11 : i32
    %227 = vector.broadcast %c11_i32 : i32 to vector<14x32xi32>
    %228 = arith.cmpi eq, %78, %227 : vector<14x32xi32>
    %c1_i32_75 = arith.constant 1 : i32
    %229 = arith.subi %168, %c1_i32_75 : i32
    %230 = vector.broadcast %229 : i32 to vector<14x32xi32>
    %231 = arith.cmpi eq, %177, %230 : vector<14x32xi32>
    %232 = arith.andi %228, %231 : vector<14x32xi1>
    %cst_76 = arith.constant 1.000000e+00 : f32
    %cst_77 = arith.constant 0.000000e+00 : f32
    %233 = vector.broadcast %cst_76 : f32 to vector<14x32xf32>
    %234 = vector.broadcast %cst_77 : f32 to vector<14x32xf32>
    %235 = arith.select %232, %233, %234 : vector<14x32xi1>, vector<14x32xf32>
    %236 = arith.addf %226, %235 : vector<14x32xf32>
    %c13_i32 = arith.constant 13 : i32
    %237 = vector.broadcast %c13_i32 : i32 to vector<14x32xi32>
    %238 = arith.cmpi eq, %78, %237 : vector<14x32xi32>
    %239 = vector.broadcast %167 : i32 to vector<14x32xi32>
    %240 = arith.cmpi sge, %177, %239 : vector<14x32xi32>
    %241 = arith.andi %238, %240 : vector<14x32xi1>
    %242 = vector.broadcast %168 : i32 to vector<14x32xi32>
    %243 = arith.cmpi slt, %177, %242 : vector<14x32xi32>
    %244 = arith.andi %241, %243 : vector<14x32xi1>
    %cst_78 = arith.constant 0.000000e+00 : f32
    %245 = vector.broadcast %175 : f32 to vector<14x32xf32>
    %246 = vector.broadcast %cst_78 : f32 to vector<14x32xf32>
    %247 = arith.select %244, %245, %246 : vector<14x32xi1>, vector<14x32xf32>
    %248 = arith.addf %236, %247 : vector<14x32xf32>
    %cst_79 = arith.constant dense<0.000000e+00> : vector<14x32xf32>
    %249 = tpu.matmul %248, %77, %cst_79 {dimension_numbers = #tpu.dot_dimension_numbers<[1], [0], [0], [1], [0, 0, 1, 1], [], []>} : vector<14x32xf32>, vector<32x32xf32>, vector<14x32xf32> -> vector<14x32xf32>
    %250 = vector.extract_strided_slice %249 {offsets = [0, 0], sizes = [2, 32], strides = [1, 1]} : vector<14x32xf32> to vector<2x32xf32>
    %c96 = arith.constant 96 : index
    %c0_80 = arith.constant 0 : index
    %251 = vector.load %arg3[%c96, %c0_80] : memref<329x32xf32, #tpu.memory_space<vmem>>, vector<32x32xf32>
    %cst_81 = arith.constant dense<0.000000e+00> : vector<2x32xf32>
    %252 = tpu.matmul %250, %251, %cst_81 {dimension_numbers = #tpu.dot_dimension_numbers<[1], [0], [0], [1], [0, 0, 1, 1], [], []>} : vector<2x32xf32>, vector<32x32xf32>, vector<2x32xf32> -> vector<2x32xf32>
    %c323 = arith.constant 323 : index
    %c0_82 = arith.constant 0 : index
    %253 = vector.load %arg3[%c323, %c0_82] : memref<329x32xf32, #tpu.memory_space<vmem>>, vector<1x32xf32>
    %254 = vector.broadcast %253 : vector<1x32xf32> to vector<2x32xf32>
    %255 = arith.addf %252, %254 : vector<2x32xf32>
    %c324 = arith.constant 324 : index
    %c0_83 = arith.constant 0 : index
    %256 = vector.load %arg3[%c324, %c0_83] : memref<329x32xf32, #tpu.memory_space<vmem>>, vector<1x32xf32>
    %c325 = arith.constant 325 : index
    %c0_84 = arith.constant 0 : index
    %257 = vector.load %arg3[%c325, %c0_84] : memref<329x32xf32, #tpu.memory_space<vmem>>, vector<1x32xf32>
    %cst_85 = arith.constant dense<0.000000e+00> : vector<2xf32>
    %258 = vector.multi_reduction <add>, %255, %cst_85 [1] : vector<2x32xf32> to vector<2xf32>
    %259 = vector.shape_cast %258 : vector<2xf32> to vector<2x1xf32>
    %cst_86 = arith.constant 3.200000e+01 : f32
    %260 = vector.broadcast %cst_86 : f32 to vector<2x1xf32>
    %261 = arith.divf %259, %260 : vector<2x1xf32>
    %262 = vector.broadcast %261 : vector<2x1xf32> to vector<2x32xf32>
    %263 = arith.subf %255, %262 : vector<2x32xf32>
    %264 = arith.mulf %263, %263 : vector<2x32xf32>
    %cst_87 = arith.constant dense<0.000000e+00> : vector<2xf32>
    %265 = vector.multi_reduction <add>, %264, %cst_87 [1] : vector<2x32xf32> to vector<2xf32>
    %266 = vector.shape_cast %265 : vector<2xf32> to vector<2x1xf32>
    %cst_88 = arith.constant 3.200000e+01 : f32
    %267 = vector.broadcast %cst_88 : f32 to vector<2x1xf32>
    %268 = arith.divf %266, %267 : vector<2x1xf32>
    %269 = vector.broadcast %261 : vector<2x1xf32> to vector<2x32xf32>
    %270 = arith.subf %255, %269 : vector<2x32xf32>
    %cst_89 = arith.constant 9.99999974E-6 : f32
    %271 = vector.broadcast %cst_89 : f32 to vector<2x1xf32>
    %272 = arith.addf %268, %271 : vector<2x1xf32>
    %273 = math.rsqrt %272 : vector<2x1xf32>
    %274 = vector.broadcast %273 : vector<2x1xf32> to vector<2x32xf32>
    %275 = arith.mulf %270, %274 : vector<2x32xf32>
    %276 = vector.broadcast %256 : vector<1x32xf32> to vector<2x32xf32>
    %277 = arith.mulf %275, %276 : vector<2x32xf32>
    %278 = vector.broadcast %257 : vector<1x32xf32> to vector<2x32xf32>
    %279 = arith.addf %277, %278 : vector<2x32xf32>
    %cst_90 = arith.constant 5.000000e-01 : f32
    %280 = vector.broadcast %cst_90 : f32 to vector<2x32xf32>
    %281 = arith.mulf %280, %279 : vector<2x32xf32>
    %cst_91 = arith.constant 0.707106769 : f32
    %282 = vector.broadcast %cst_91 : f32 to vector<2x32xf32>
    %283 = arith.mulf %279, %282 : vector<2x32xf32>
    %cst_92 = arith.constant 0.000000e+00 : f32
    %284 = vector.broadcast %cst_92 : f32 to vector<2x32xf32>
    %285 = arith.cmpf oge, %283, %284 : vector<2x32xf32>
    %cst_93 = arith.constant 1.000000e+00 : f32
    %cst_94 = arith.constant -1.000000e+00 : f32
    %286 = vector.broadcast %cst_93 : f32 to vector<2x32xf32>
    %287 = vector.broadcast %cst_94 : f32 to vector<2x32xf32>
    %288 = arith.select %285, %286, %287 : vector<2x32xi1>, vector<2x32xf32>
    %289 = math.absf %283 : vector<2x32xf32>
    %cst_95 = arith.constant 0.327591091 : f32
    %290 = vector.broadcast %cst_95 : f32 to vector<2x32xf32>
    %291 = arith.mulf %290, %289 : vector<2x32xf32>
    %cst_96 = arith.constant 1.000000e+00 : f32
    %292 = vector.broadcast %cst_96 : f32 to vector<2x32xf32>
    %293 = arith.addf %292, %291 : vector<2x32xf32>
    %cst_97 = arith.constant 1.000000e+00 : f32
    %294 = vector.broadcast %cst_97 : f32 to vector<2x32xf32>
    %295 = arith.divf %294, %293 : vector<2x32xf32>
    %cst_98 = arith.constant 1.06140542 : f32
    %296 = vector.broadcast %cst_98 : f32 to vector<2x32xf32>
    %297 = arith.mulf %295, %296 : vector<2x32xf32>
    %cst_99 = arith.constant -1.45315206 : f32
    %298 = vector.broadcast %cst_99 : f32 to vector<2x32xf32>
    %299 = arith.addf %298, %297 : vector<2x32xf32>
    %300 = arith.mulf %295, %299 : vector<2x32xf32>
    %cst_100 = arith.constant 1.42141378 : f32
    %301 = vector.broadcast %cst_100 : f32 to vector<2x32xf32>
    %302 = arith.addf %301, %300 : vector<2x32xf32>
    %303 = arith.mulf %295, %302 : vector<2x32xf32>
    %cst_101 = arith.constant -0.284496725 : f32
    %304 = vector.broadcast %cst_101 : f32 to vector<2x32xf32>
    %305 = arith.addf %304, %303 : vector<2x32xf32>
    %306 = arith.mulf %295, %305 : vector<2x32xf32>
    %cst_102 = arith.constant 0.254829586 : f32
    %307 = vector.broadcast %cst_102 : f32 to vector<2x32xf32>
    %308 = arith.addf %307, %306 : vector<2x32xf32>
    %309 = arith.mulf %295, %308 : vector<2x32xf32>
    %cst_103 = arith.constant 0.000000e+00 : f32
    %310 = vector.broadcast %cst_103 : f32 to vector<2x32xf32>
    %311 = arith.subf %310, %289 : vector<2x32xf32>
    %312 = arith.mulf %311, %289 : vector<2x32xf32>
    %313 = math.exp %312 : vector<2x32xf32>
    %314 = arith.mulf %309, %313 : vector<2x32xf32>
    %cst_104 = arith.constant 1.000000e+00 : f32
    %315 = vector.broadcast %cst_104 : f32 to vector<2x32xf32>
    %316 = arith.subf %315, %314 : vector<2x32xf32>
    %317 = arith.mulf %288, %316 : vector<2x32xf32>
    %cst_105 = arith.constant 1.000000e+00 : f32
    %318 = vector.broadcast %cst_105 : f32 to vector<2x32xf32>
    %319 = arith.addf %318, %317 : vector<2x32xf32>
    %320 = arith.mulf %281, %319 : vector<2x32xf32>
    %321 = vector.extract_strided_slice %249 {offsets = [2, 0], sizes = [2, 32], strides = [1, 1]} : vector<14x32xf32> to vector<2x32xf32>
    %c128 = arith.constant 128 : index
    %c0_106 = arith.constant 0 : index
    %322 = vector.load %arg3[%c128, %c0_106] : memref<329x32xf32, #tpu.memory_space<vmem>>, vector<32x32xf32>
    %cst_107 = arith.constant dense<0.000000e+00> : vector<2x32xf32>
    %323 = tpu.matmul %321, %322, %cst_107 {dimension_numbers = #tpu.dot_dimension_numbers<[1], [0], [0], [1], [0, 0, 1, 1], [], []>} : vector<2x32xf32>, vector<32x32xf32>, vector<2x32xf32> -> vector<2x32xf32>
    %c160 = arith.constant 160 : index
    %c0_108 = arith.constant 0 : index
    %324 = vector.load %arg3[%c160, %c0_108] : memref<329x32xf32, #tpu.memory_space<vmem>>, vector<32x32xf32>
    %325 = vector.extract_strided_slice %249 {offsets = [4, 0], sizes = [2, 32], strides = [1, 1]} : vector<14x32xf32> to vector<2x32xf32>
    %cst_109 = arith.constant dense<0.000000e+00> : vector<2x32xf32>
    %326 = tpu.matmul %325, %324, %cst_109 {dimension_numbers = #tpu.dot_dimension_numbers<[1], [0], [0], [1], [0, 0, 1, 1], [], []>} : vector<2x32xf32>, vector<32x32xf32>, vector<2x32xf32> -> vector<2x32xf32>
    %327 = arith.addf %323, %326 : vector<2x32xf32>
    %c192 = arith.constant 192 : index
    %c0_110 = arith.constant 0 : index
    %328 = vector.load %arg3[%c192, %c0_110] : memref<329x32xf32, #tpu.memory_space<vmem>>, vector<32x32xf32>
    %329 = vector.extract_strided_slice %249 {offsets = [6, 0], sizes = [2, 32], strides = [1, 1]} : vector<14x32xf32> to vector<2x32xf32>
    %cst_111 = arith.constant dense<0.000000e+00> : vector<2x32xf32>
    %330 = tpu.matmul %329, %328, %cst_111 {dimension_numbers = #tpu.dot_dimension_numbers<[1], [0], [0], [1], [0, 0, 1, 1], [], []>} : vector<2x32xf32>, vector<32x32xf32>, vector<2x32xf32> -> vector<2x32xf32>
    %331 = arith.addf %327, %330 : vector<2x32xf32>
    %c224 = arith.constant 224 : index
    %c0_112 = arith.constant 0 : index
    %332 = vector.load %arg3[%c224, %c0_112] : memref<329x32xf32, #tpu.memory_space<vmem>>, vector<32x32xf32>
    %333 = vector.extract_strided_slice %249 {offsets = [8, 0], sizes = [2, 32], strides = [1, 1]} : vector<14x32xf32> to vector<2x32xf32>
    %cst_113 = arith.constant dense<0.000000e+00> : vector<2x32xf32>
    %334 = tpu.matmul %333, %332, %cst_113 {dimension_numbers = #tpu.dot_dimension_numbers<[1], [0], [0], [1], [0, 0, 1, 1], [], []>} : vector<2x32xf32>, vector<32x32xf32>, vector<2x32xf32> -> vector<2x32xf32>
    %335 = arith.addf %331, %334 : vector<2x32xf32>
    %c256 = arith.constant 256 : index
    %c0_114 = arith.constant 0 : index
    %336 = vector.load %arg3[%c256, %c0_114] : memref<329x32xf32, #tpu.memory_space<vmem>>, vector<32x32xf32>
    %337 = vector.extract_strided_slice %249 {offsets = [10, 0], sizes = [2, 32], strides = [1, 1]} : vector<14x32xf32> to vector<2x32xf32>
    %cst_115 = arith.constant dense<0.000000e+00> : vector<2x32xf32>
    %338 = tpu.matmul %337, %336, %cst_115 {dimension_numbers = #tpu.dot_dimension_numbers<[1], [0], [0], [1], [0, 0, 1, 1], [], []>} : vector<2x32xf32>, vector<32x32xf32>, vector<2x32xf32> -> vector<2x32xf32>
    %339 = arith.addf %335, %338 : vector<2x32xf32>
    %c288 = arith.constant 288 : index
    %c0_116 = arith.constant 0 : index
    %340 = vector.load %arg3[%c288, %c0_116] : memref<329x32xf32, #tpu.memory_space<vmem>>, vector<32x32xf32>
    %341 = vector.extract_strided_slice %249 {offsets = [12, 0], sizes = [2, 32], strides = [1, 1]} : vector<14x32xf32> to vector<2x32xf32>
    %cst_117 = arith.constant dense<0.000000e+00> : vector<2x32xf32>
    %342 = tpu.matmul %341, %340, %cst_117 {dimension_numbers = #tpu.dot_dimension_numbers<[1], [0], [0], [1], [0, 0, 1, 1], [], []>} : vector<2x32xf32>, vector<32x32xf32>, vector<2x32xf32> -> vector<2x32xf32>
    %343 = arith.addf %339, %342 : vector<2x32xf32>
    %c326 = arith.constant 326 : index
    %c0_118 = arith.constant 0 : index
    %344 = vector.load %arg3[%c326, %c0_118] : memref<329x32xf32, #tpu.memory_space<vmem>>, vector<1x32xf32>
    %345 = vector.broadcast %344 : vector<1x32xf32> to vector<2x32xf32>
    %346 = arith.addf %343, %345 : vector<2x32xf32>
    %c327 = arith.constant 327 : index
    %c0_119 = arith.constant 0 : index
    %347 = vector.load %arg3[%c327, %c0_119] : memref<329x32xf32, #tpu.memory_space<vmem>>, vector<1x32xf32>
    %c328 = arith.constant 328 : index
    %c0_120 = arith.constant 0 : index
    %348 = vector.load %arg3[%c328, %c0_120] : memref<329x32xf32, #tpu.memory_space<vmem>>, vector<1x32xf32>
    %cst_121 = arith.constant dense<0.000000e+00> : vector<2xf32>
    %349 = vector.multi_reduction <add>, %346, %cst_121 [1] : vector<2x32xf32> to vector<2xf32>
    %350 = vector.shape_cast %349 : vector<2xf32> to vector<2x1xf32>
    %cst_122 = arith.constant 3.200000e+01 : f32
    %351 = vector.broadcast %cst_122 : f32 to vector<2x1xf32>
    %352 = arith.divf %350, %351 : vector<2x1xf32>
    %353 = vector.broadcast %352 : vector<2x1xf32> to vector<2x32xf32>
    %354 = arith.subf %346, %353 : vector<2x32xf32>
    %355 = arith.mulf %354, %354 : vector<2x32xf32>
    %cst_123 = arith.constant dense<0.000000e+00> : vector<2xf32>
    %356 = vector.multi_reduction <add>, %355, %cst_123 [1] : vector<2x32xf32> to vector<2xf32>
    %357 = vector.shape_cast %356 : vector<2xf32> to vector<2x1xf32>
    %cst_124 = arith.constant 3.200000e+01 : f32
    %358 = vector.broadcast %cst_124 : f32 to vector<2x1xf32>
    %359 = arith.divf %357, %358 : vector<2x1xf32>
    %360 = vector.broadcast %352 : vector<2x1xf32> to vector<2x32xf32>
    %361 = arith.subf %346, %360 : vector<2x32xf32>
    %cst_125 = arith.constant 9.99999974E-6 : f32
    %362 = vector.broadcast %cst_125 : f32 to vector<2x1xf32>
    %363 = arith.addf %359, %362 : vector<2x1xf32>
    %364 = math.rsqrt %363 : vector<2x1xf32>
    %365 = vector.broadcast %364 : vector<2x1xf32> to vector<2x32xf32>
    %366 = arith.mulf %361, %365 : vector<2x32xf32>
    %367 = vector.broadcast %347 : vector<1x32xf32> to vector<2x32xf32>
    %368 = arith.mulf %366, %367 : vector<2x32xf32>
    %369 = vector.broadcast %348 : vector<1x32xf32> to vector<2x32xf32>
    %370 = arith.addf %368, %369 : vector<2x32xf32>
    %cst_126 = arith.constant 5.000000e-01 : f32
    %371 = vector.broadcast %cst_126 : f32 to vector<2x32xf32>
    %372 = arith.mulf %371, %370 : vector<2x32xf32>
    %cst_127 = arith.constant 0.707106769 : f32
    %373 = vector.broadcast %cst_127 : f32 to vector<2x32xf32>
    %374 = arith.mulf %370, %373 : vector<2x32xf32>
    %cst_128 = arith.constant 0.000000e+00 : f32
    %375 = vector.broadcast %cst_128 : f32 to vector<2x32xf32>
    %376 = arith.cmpf oge, %374, %375 : vector<2x32xf32>
    %cst_129 = arith.constant 1.000000e+00 : f32
    %cst_130 = arith.constant -1.000000e+00 : f32
    %377 = vector.broadcast %cst_129 : f32 to vector<2x32xf32>
    %378 = vector.broadcast %cst_130 : f32 to vector<2x32xf32>
    %379 = arith.select %376, %377, %378 : vector<2x32xi1>, vector<2x32xf32>
    %380 = math.absf %374 : vector<2x32xf32>
    %cst_131 = arith.constant 0.327591091 : f32
    %381 = vector.broadcast %cst_131 : f32 to vector<2x32xf32>
    %382 = arith.mulf %381, %380 : vector<2x32xf32>
    %cst_132 = arith.constant 1.000000e+00 : f32
    %383 = vector.broadcast %cst_132 : f32 to vector<2x32xf32>
    %384 = arith.addf %383, %382 : vector<2x32xf32>
    %cst_133 = arith.constant 1.000000e+00 : f32
    %385 = vector.broadcast %cst_133 : f32 to vector<2x32xf32>
    %386 = arith.divf %385, %384 : vector<2x32xf32>
    %cst_134 = arith.constant 1.06140542 : f32
    %387 = vector.broadcast %cst_134 : f32 to vector<2x32xf32>
    %388 = arith.mulf %386, %387 : vector<2x32xf32>
    %cst_135 = arith.constant -1.45315206 : f32
    %389 = vector.broadcast %cst_135 : f32 to vector<2x32xf32>
    %390 = arith.addf %389, %388 : vector<2x32xf32>
    %391 = arith.mulf %386, %390 : vector<2x32xf32>
    %cst_136 = arith.constant 1.42141378 : f32
    %392 = vector.broadcast %cst_136 : f32 to vector<2x32xf32>
    %393 = arith.addf %392, %391 : vector<2x32xf32>
    %394 = arith.mulf %386, %393 : vector<2x32xf32>
    %cst_137 = arith.constant -0.284496725 : f32
    %395 = vector.broadcast %cst_137 : f32 to vector<2x32xf32>
    %396 = arith.addf %395, %394 : vector<2x32xf32>
    %397 = arith.mulf %386, %396 : vector<2x32xf32>
    %cst_138 = arith.constant 0.254829586 : f32
    %398 = vector.broadcast %cst_138 : f32 to vector<2x32xf32>
    %399 = arith.addf %398, %397 : vector<2x32xf32>
    %400 = arith.mulf %386, %399 : vector<2x32xf32>
    %cst_139 = arith.constant 0.000000e+00 : f32
    %401 = vector.broadcast %cst_139 : f32 to vector<2x32xf32>
    %402 = arith.subf %401, %380 : vector<2x32xf32>
    %403 = arith.mulf %402, %380 : vector<2x32xf32>
    %404 = math.exp %403 : vector<2x32xf32>
    %405 = arith.mulf %400, %404 : vector<2x32xf32>
    %cst_140 = arith.constant 1.000000e+00 : f32
    %406 = vector.broadcast %cst_140 : f32 to vector<2x32xf32>
    %407 = arith.subf %406, %405 : vector<2x32xf32>
    %408 = arith.mulf %379, %407 : vector<2x32xf32>
    %cst_141 = arith.constant 1.000000e+00 : f32
    %409 = vector.broadcast %cst_141 : f32 to vector<2x32xf32>
    %410 = arith.addf %409, %408 : vector<2x32xf32>
    %411 = arith.mulf %372, %410 : vector<2x32xf32>
    %c0_142 = arith.constant 0 : index
    %c0_143 = arith.constant 0 : index
    %412 = vector.load %arg4[%c0_142, %c0_143] : memref<194x128xf32, #tpu.memory_space<vmem>>, vector<32x128xf32>
    %cst_144 = arith.constant dense<0.000000e+00> : vector<2x128xf32>
    %413 = tpu.matmul %320, %412, %cst_144 {dimension_numbers = #tpu.dot_dimension_numbers<[1], [0], [0], [1], [0, 0, 1, 1], [], []>} : vector<2x32xf32>, vector<32x128xf32>, vector<2x128xf32> -> vector<2x128xf32>
    %c32 = arith.constant 32 : index
    %c0_145 = arith.constant 0 : index
    %414 = vector.load %arg4[%c32, %c0_145] : memref<194x128xf32, #tpu.memory_space<vmem>>, vector<32x128xf32>
    %cst_146 = arith.constant dense<0.000000e+00> : vector<2x128xf32>
    %415 = tpu.matmul %411, %414, %cst_146 {dimension_numbers = #tpu.dot_dimension_numbers<[1], [0], [0], [1], [0, 0, 1, 1], [], []>} : vector<2x32xf32>, vector<32x128xf32>, vector<2x128xf32> -> vector<2x128xf32>
    %416 = arith.addf %413, %415 : vector<2x128xf32>
    %c64_147 = arith.constant 64 : index
    %c0_148 = arith.constant 0 : index
    %417 = vector.load %arg4[%c64_147, %c0_148] : memref<194x128xf32, #tpu.memory_space<vmem>>, vector<1x128xf32>
    %418 = vector.broadcast %417 : vector<1x128xf32> to vector<2x128xf32>
    %419 = arith.addf %416, %418 : vector<2x128xf32>
    %cst_149 = arith.constant 5.000000e-01 : f32
    %420 = vector.broadcast %cst_149 : f32 to vector<2x128xf32>
    %421 = arith.mulf %420, %419 : vector<2x128xf32>
    %cst_150 = arith.constant 0.707106769 : f32
    %422 = vector.broadcast %cst_150 : f32 to vector<2x128xf32>
    %423 = arith.mulf %419, %422 : vector<2x128xf32>
    %cst_151 = arith.constant 0.000000e+00 : f32
    %424 = vector.broadcast %cst_151 : f32 to vector<2x128xf32>
    %425 = arith.cmpf oge, %423, %424 : vector<2x128xf32>
    %cst_152 = arith.constant 1.000000e+00 : f32
    %cst_153 = arith.constant -1.000000e+00 : f32
    %426 = vector.broadcast %cst_152 : f32 to vector<2x128xf32>
    %427 = vector.broadcast %cst_153 : f32 to vector<2x128xf32>
    %428 = arith.select %425, %426, %427 : vector<2x128xi1>, vector<2x128xf32>
    %429 = math.absf %423 : vector<2x128xf32>
    %cst_154 = arith.constant 0.327591091 : f32
    %430 = vector.broadcast %cst_154 : f32 to vector<2x128xf32>
    %431 = arith.mulf %430, %429 : vector<2x128xf32>
    %cst_155 = arith.constant 1.000000e+00 : f32
    %432 = vector.broadcast %cst_155 : f32 to vector<2x128xf32>
    %433 = arith.addf %432, %431 : vector<2x128xf32>
    %cst_156 = arith.constant 1.000000e+00 : f32
    %434 = vector.broadcast %cst_156 : f32 to vector<2x128xf32>
    %435 = arith.divf %434, %433 : vector<2x128xf32>
    %cst_157 = arith.constant 1.06140542 : f32
    %436 = vector.broadcast %cst_157 : f32 to vector<2x128xf32>
    %437 = arith.mulf %435, %436 : vector<2x128xf32>
    %cst_158 = arith.constant -1.45315206 : f32
    %438 = vector.broadcast %cst_158 : f32 to vector<2x128xf32>
    %439 = arith.addf %438, %437 : vector<2x128xf32>
    %440 = arith.mulf %435, %439 : vector<2x128xf32>
    %cst_159 = arith.constant 1.42141378 : f32
    %441 = vector.broadcast %cst_159 : f32 to vector<2x128xf32>
    %442 = arith.addf %441, %440 : vector<2x128xf32>
    %443 = arith.mulf %435, %442 : vector<2x128xf32>
    %cst_160 = arith.constant -0.284496725 : f32
    %444 = vector.broadcast %cst_160 : f32 to vector<2x128xf32>
    %445 = arith.addf %444, %443 : vector<2x128xf32>
    %446 = arith.mulf %435, %445 : vector<2x128xf32>
    %cst_161 = arith.constant 0.254829586 : f32
    %447 = vector.broadcast %cst_161 : f32 to vector<2x128xf32>
    %448 = arith.addf %447, %446 : vector<2x128xf32>
    %449 = arith.mulf %435, %448 : vector<2x128xf32>
    %cst_162 = arith.constant 0.000000e+00 : f32
    %450 = vector.broadcast %cst_162 : f32 to vector<2x128xf32>
    %451 = arith.subf %450, %429 : vector<2x128xf32>
    %452 = arith.mulf %451, %429 : vector<2x128xf32>
    %453 = math.exp %452 : vector<2x128xf32>
    %454 = arith.mulf %449, %453 : vector<2x128xf32>
    %cst_163 = arith.constant 1.000000e+00 : f32
    %455 = vector.broadcast %cst_163 : f32 to vector<2x128xf32>
    %456 = arith.subf %455, %454 : vector<2x128xf32>
    %457 = arith.mulf %428, %456 : vector<2x128xf32>
    %cst_164 = arith.constant 1.000000e+00 : f32
    %458 = vector.broadcast %cst_164 : f32 to vector<2x128xf32>
    %459 = arith.addf %458, %457 : vector<2x128xf32>
    %460 = arith.mulf %421, %459 : vector<2x128xf32>
    %c65 = arith.constant 65 : index
    %c0_165 = arith.constant 0 : index
    %461 = vector.load %arg4[%c65, %c0_165] : memref<194x128xf32, #tpu.memory_space<vmem>>, vector<128x128xf32>
    %cst_166 = arith.constant dense<0.000000e+00> : vector<2x128xf32>
    %462 = tpu.matmul %460, %461, %cst_166 {dimension_numbers = #tpu.dot_dimension_numbers<[1], [0], [0], [1], [0, 0, 1, 1], [], []>} : vector<2x128xf32>, vector<128x128xf32>, vector<2x128xf32> -> vector<2x128xf32>
    %c193 = arith.constant 193 : index
    %c0_167 = arith.constant 0 : index
    %463 = vector.load %arg4[%c193, %c0_167] : memref<194x128xf32, #tpu.memory_space<vmem>>, vector<1x128xf32>
    %464 = vector.broadcast %463 : vector<1x128xf32> to vector<2x128xf32>
    %465 = arith.addf %462, %464 : vector<2x128xf32>
    %c0_168 = arith.constant 0 : index
    %c0_169 = arith.constant 0 : index
    %466 = vector.load %arg5[%c0_168, %c0_169] : memref<2x128xf32, #tpu.memory_space<vmem>>, vector<2x128xf32>
    tpu.vector_store %arg5[%c0_168, %c0_169], %465 {strides = array<i32>} : memref<2x128xf32, #tpu.memory_space<vmem>>, vector<2x128xf32>,
    return
  }
  func.func @transform_0(%arg0: i32, %arg1: memref<2x5xi32, #tpu.memory_space<smem>>) -> (i32, i32) {
    %c0_i32 = arith.constant 0 : i32
    %c0_i32_0 = arith.constant 0 : i32
    %c0_i32_1 = arith.constant 0 : i32
    return %c0_i32, %c0_i32_0 : i32, i32
  }
  func.func @transform_1(%arg0: i32, %arg1: memref<2x5xi32, #tpu.memory_space<smem>>) -> (i32, i32) {
    %c0_i32 = arith.constant 0 : i32
    %c0_i32_0 = arith.constant 0 : i32
    %c0_i32_1 = arith.constant 0 : i32
    return %c0_i32, %c0_i32_0 : i32, i32
  }
  func.func @transform_2(%arg0: i32, %arg1: memref<2x5xi32, #tpu.memory_space<smem>>) -> (i32, i32) {
    %c0_i32 = arith.constant 0 : i32
    %c0_i32_0 = arith.constant 0 : i32
    %c0_i32_1 = arith.constant 0 : i32
    return %c0_i32, %c0_i32_0 : i32, i32
  }
  func.func @transform_3(%arg0: i32, %arg1: memref<2x5xi32, #tpu.memory_space<smem>>) -> (i32, i32) {
    %c0_i32 = arith.constant 0 : i32
    %c0_i32_0 = arith.constant 0 : i32
    %c0_i32_1 = arith.constant 0 : i32
    return %c0_i32, %c0_i32_0 : i32, i32
  }
}

</mosaic_0001>

<bundles_post_ra>
// kernel: cr_model_forward.1
= control target key start
LH: loop header
LB: loop body
LE: loop exit
PB: predicated region body
PF: predicated region fallthrough
CT: control target
= control target key end

     0   :  { %s2768_s0 = inlined_call_operand.vmem [shape: s32[2,5], index: 0, kind: input, shape index: {}]   ;;  %s2769_s1 = inlined_call_operand.vmem [shape: s32[32,1], index: 1, kind: input, shape index: {}]   ;;  %s2770_s2 = inlined_call_operand.vmem [shape: f32[329,32], index: 2, kind: input, shape index: {}]   ;;  %s2771_s3 = inlined_call_operand.vmem [shape: f32[194,128], index: 3, kind: input, shape index: {}]   ;;  %s2772_s4 = inlined_call_operand.hbm [shape: f32[2,128], index: 4, kind: output, shape index: {}]  }
   0x1   :  { %s9_s17 = sshll.u32 %s2768_s0, 4  ;;  %s10_s17 = int_to_ptr.vmem [resolvable:$true] %s9_s17 }
   0x2   :  { %s2163_s18 = scalar_lea.vmem %s10_s17, 32  ;;  %p2168_p1 = scmp.lt.s32.totalorder %s10_s17, %s10_s17 }
   0x3   :  { %p2164_p0 = scmp.ne.s32.totalorder %s10_s17, %s2163_s18  ;;  %p2169_p2 = scmp.lt.s32.totalorder %s2163_s18, %s2163_s18 }
   0x5   :  { %p2170_p3 = por %p2169_p2, %p2168_p1 }
   0x7   :  { %p2171_p4 = pnand %p2170_p3, %p2164_p0 }
   0x9   :  { %2174 = shalt.err (!%p2171_p4)  }
   0xa   :  { %s2201_s19 = smov [#allocation3]  }
   0xb   :  { %12 = dma.vmem_to_smem %s10_s17, 32, %s2201_s19, [#allocation2] }
   0xc   :  { %2197 = dma.done.wait [#allocation2], 32 }
   0xd   :  { %2198 = vsyncadd [#allocation2], 4294967264 }
   0xe   :  { %14 = sfence }
   0xf   :  { %v24_v0 = vld [vmem:[%s2769_s1 + $0x10] sm:$0xff]  ;;  %v22_v1 = vld [vmem:[%s2769_s1] sm:$0xff]  ;;  %v2202_v2 = vmov 0   ;;  %v53_v4 = vld [vmem:[%s2770_s2 + $0x8] sm:$0xff] }
  0x10   :  { %2114 = vset.pattern.permute.xlu1 %v2202_v2  ;;  %2113 = vset.pattern.permute.xlu0 %v2202_v2  ;;  %v52_v3 = vld [vmem:[%s2770_s2] sm:$0xff]  ;;  %v25_v5 = vld [vmem:[%s2769_s1 + $0x18] sm:$0xff]  ;;  %v54_v7 = vld [vmem:[%s2770_s2 + $0x10] sm:$0xff] }
  0x11   :  { %35 = vperm.xlu1 %2114, %v24_v0   ;;  %29 = vperm.xlu0 %2113, %v22_v1   ;;  %v1988_v6 = vpack.c.bf16 %v53_v4, %v52_v3  ;;  %v55_v8 = vld [vmem:[%s2770_s2 + $0x18] sm:$0xff]  ;;  %v23_v9 = vld [vmem:[%s2769_s1 + $0x8] sm:$0xff]  ;;  %v56_v11 = vld [vmem:[%s2770_s2 + $0x20] sm:$0xff] }
  0x12   :  { %v1992_v10 = vpack.c.bf16 %v55_v8, %v54_v7  ;;  %v57_v12 = vld [vmem:[%s2770_s2 + $0x28] sm:$0xff] }
  0x13   :  { %1989 = vmatprep.subr.bf16.mxu0 %v1988_v6 }
  0x14   :  { %15 = vsyncpa [#allocation5], 0  ;;  %1991 = vmatpush3.bf16.msra.mxu0 %v1988_v6  ;;  %v1996_v13 = vpack.c.bf16 %v57_v12, %v56_v11  ;;  %v58_v14 = vld [vmem:[%s2770_s2 + $0x30] sm:$0xff]  ;;  %v59_v15 = vld [vmem:[%s2770_s2 + $0x38] sm:$0xff]  ;;  %v26_v20 = vlaneseq  ;;  %vm60_vm0 = vcmask 523264   ;;  %v2203_v24 = vmov 0.0  }
  0x15   :  { %38 = vperm.xlu1 %2114, %v25_v5   ;;  %32 = vperm.xlu0 %2113, %v23_v9   ;;  %v2000_v16 = vpack.c.bf16 %v59_v15, %v58_v14  ;;  %v158_v17 = vld [vmem:[%s2770_s2 + $0x40] sm:$0xff]  ;;  %v159_v18 = vld [vmem:[%s2770_s2 + $0x48] sm:$0xff]  ;;  %v160_v26 = vld [vmem:[%s2770_s2 + $0x50] sm:$0xff]  ;;  %vm167_vm5 = vcmask 261120   ;;  %s2330_s25 = sld [smem:[#allocation3]]  ;;  %s2332_s26 = sld [smem:[#allocation3 + $0x1]] }
  0x16   :  { %1993 = vmatprep.subr.bf16.mxu0 %v1992_v10  ;;  %v2004_v19 = vpack.c.bf16 %v159_v18, %v158_v17  ;;  %v2279_v21 = vand.u32 127, %v26_v20  ;;  %v161_v27 = vld [vmem:[%s2770_s2 + $0x58] sm:$0xff]  ;;  %v1679_v38 = vld [vmem:[%s2770_s2 + $0x140] ss:$0 sm:$0xff]  ;;  %s2334_s27 = sld [smem:[#allocation3 + $0x2]]  ;;  %s2336_s28 = sld [smem:[#allocation3 + $0x3]] }
  0x17   :  { %v2008_v31 = vpack.c.bf16 %v161_v27, %v160_v26  ;;  %s2340_s5 = sld [smem:[#allocation3 + $0x80]]  ;;  %s2342_s6 = sld [smem:[#allocation3 + $0x81]] }
  0x18   :  { %1995 = vmatpush3.bf16.msra.mxu0 %v1992_v10  ;;  %s2346_s8 = sld [smem:[#allocation3 + $0x82]]  ;;  %s2348_s10 = sld [smem:[#allocation3 + $0x83]] }
  0x19   :  { %1997 = vmatprep.subr.bf16.mxu0 %v1996_v13  ;;  %s1689_s1 = sld [smem:[#allocation3 + $0x4]] }
  0x1a   :  { %s1696_s16 = sld [smem:[#allocation3 + $0x84]] }
  0x1b   :  { %s452_s29 = ssub.s32 %s2332_s26, %s2330_s25  ;;  %v474_v14 = vstv %s2330_s25  ;;  %s1690_s15 = sadd.s32 4294967295, %s2332_s26  ;;  %v498_v15 = vstv %s2332_s26 }
  0x1c   :  { %1999 = vmatpush3.bf16.msra.mxu0 %v1996_v13  ;;  %s453_s30 = scvt.s32.f32 %s452_s29  ;;  %s457_s7 = ssub.s32 %s2336_s28, %s2334_s27  ;;  %v2355_v13 = vshrl.u32 %v26_v20, 7  ;;  %vm475_vm6 = vcmp.eq.s32.totalorder %v2279_v21, %v474_v14  ;;  %vm495_vm10 = vcmp.ge.s32.totalorder %v2279_v21, %v474_v14  ;;  %vm2367_vm13 = vcmp.lt.s32.totalorder %v2279_v21, %v498_v15 }
  0x1d   :  { %2001 = vmatprep.subr.bf16.mxu0 %v2000_v16  ;;  %s458_s9 = scvt.s32.f32 %s457_s7  ;;  %s547_s11 = ssub.s32 %s2342_s6, %s2340_s5 }
  0x1e   :  { %v454_v7 = vstv %s453_s30  ;;  %s548_s12 = scvt.s32.f32 %s547_s11  ;;  %s552_s13 = ssub.s32 %s2348_s10, %s2346_s8  ;;  %vm472_vm7 = vcmp.eq.s32.totalorder %v2355_v13, 2  ;;  %vm482_vm8 = vcmp.eq.s32.totalorder %v2355_v13, 4  ;;  %vm493_vm12 = vcmp.eq.s32.totalorder %v2355_v13, 6 }
  0x1f   :  { %2115 = vrcp.f32 %v454_v7  ;;  %v459_v8 = vstv %s458_s9  ;;  %s553_s14 = scvt.s32.f32 %s552_s13  ;;  %vm476_vm11 = vmand %vm472_vm7, %vm475_vm6  ;;  %vm462_vm15 = vcmp.eq.s32.totalorder %v2355_v13, 0  ;;  %s1691_s17 = sadd.s32 4294967295, %s2336_s28 }
  0x20   :  { %2003 = vmatpush3.bf16.msra.mxu0 %v2000_v16  ;;  %2117 = vrcp.f32 %v459_v8  ;;  %v549_v9 = vstv %s548_s12  ;;  %v485_v16 = vstv %s1690_s15  ;;  %s1699_s20 = sadd.s32 4294967295, %s2348_s10  ;;  %s1698_s22 = sadd.s32 4294967295, %s2342_s6  ;;  %v2204_v8 = vmov 0.0|0.0  }
  0x21   :  { %2005 = vmatprep.subr.bf16.mxu0 %v2004_v19  ;;  %2119 = vrcp.f32 %v549_v9  ;;  %v554_v10 = vstv %s553_s14  ;;  %vm486_vm9 = vcmp.eq.s32.totalorder %v2279_v21, %v485_v16  ;;  %s2207_s7 = smov [#allocation4]  }
  0x22   :  { %2121 = vrcp.f32 %v554_v10  ;;  %vm487_vm14 = vmand %vm482_vm8, %vm486_vm9  ;;  %v721_v10 = vld [vmem:[%s2770_s2 + $0x70] sm:$0xff] }
  0x23   :  { %v489_v26 = vsel %vm487_vm14, 1.0, %v2203_v24 }
  0x29   :  { %v2116_v11 = vpop.eup %2115 }
  0x2a   :  { %2098 = vpush %v2116_v11  ;;  %v2118_v12 = vpop.eup %2117 }
  0x2b   :  { %2100 = vpush %v2118_v12  ;;  %v2120_v17 = vpop.eup %2119  ;;  %v722_v12 = vld [vmem:[%s2770_s2 + $0x78] sm:$0xff] }
  0x2c   :  { %2102 = vpush %v2120_v17  ;;  %v2024_v14 = vpack.c.bf16 %v722_v12, %v721_v10 }
  0x5b   :  { %s2099_s18 = spop %2098 }
  0x5c   :  { %s2101_s19 = spop %2100 }
  0x5d   :  { %s2423_s21 = spop %2102 }
  0x90   :  { %v36_v22 = vpop.permute.xlu1 %35  ;;  %v30_v23 = vpop.permute.xlu0 %29 }
  0x91   :  { %vm40_vm1 = vcmp.eq.s32.totalorder %v2279_v21, %v30_v23  ;;  %vm42_vm2 = vcmp.eq.s32.totalorder %v2279_v21, %v36_v22  ;;  %v464_v22 = vstv %s1689_s1  ;;  %v478_v23 = vsel %vm476_vm11, 1.0, %v2203_v24 }
  0x92   :  { %v1671_v25 = vsel %vm40_vm1, 1.0, %v2203_v24  ;;  %v1673_v30 = vsel %vm42_vm2, 1.0, %v2203_v24  ;;  %vm465_vm2 = vcmp.eq.s32.totalorder %v2279_v21, %v464_v22 }
  0x93   :  { %1823 = vmatprep.mubr.msk.f32.mxu0 %vm60_vm0, %v1671_v25 }
  0x94   :  { %v39_v28 = vpop.permute.xlu1 %38  ;;  %v33_v29 = vpop.permute.xlu0 %32 }
  0x95   :  { %vm41_vm3 = vcmp.eq.s32.totalorder %v2279_v21, %v33_v29  ;;  %vm43_vm4 = vcmp.eq.s32.totalorder %v2279_v21, %v39_v28  ;;  %v2385_v29 = vadd.s32 4294967280, %v2279_v21 }
  0x96   :  { %v1672_v32 = vsel %vm41_vm3, 1.0, %v2203_v24  ;;  %v1674_v33 = vsel %vm43_vm4, 1.0, %v2203_v24  ;;  %vm466_vm3 = vmand %vm462_vm15, %vm465_vm2  ;;  %vm558_vm4 = vcmp.eq.s32.totalorder %v2355_v13, 1 }
  0x97   :  { %1824 = vmatmul.mubr.msk.f32.vlgmr.msra.gmra.mrb[0].mxu0 %vm60_vm0, %v1672_v32  ;;  %v468_v25 = vsel %vm466_vm3, 1.0, %v2203_v24  ;;  %v509_v32 = vstv %s2334_s27 }
  0x98   :  { %1826 = vmatprep.mubr.msk.f32.mxu0 %vm60_vm0, %v1673_v30  ;;  %2007 = vmatpush3.bf16.msra.mxu0 %v2004_v19  ;;  %v2122_v19 = vpop.eup %2121  ;;  %v480_v27 = vadd.f32 %v478_v23, %v468_v25  ;;  %v560_v30 = vstv %s1696_s16  ;;  %vm510_vm9 = vcmp.eq.s32.totalorder %v2279_v21, %v509_v32  ;;  %vm530_vm15 = vcmp.ge.s32.totalorder %v2279_v21, %v509_v32 }
  0x99   :  { %2009 = vmatprep.subr.bf16.mxu0 %v2008_v31  ;;  %2104 = vpush %v2122_v19  ;;  %vm561_vm6 = vcmp.eq.s32.totalorder %v2385_v29, %v560_v30 }
  0x9a   :  { %v491_v28 = vadd.f32 %v489_v26, %v480_v27  ;;  %vm2392_vm7 = vmand %vm558_vm4, %vm561_vm6 }
  0x9b   :  { %1827 = vmatmul.mubr.msk.f32.gmra.mrb[2].mxu0 %vm60_vm0, %v1674_v33  ;;  %vm2372_vm0 = vmand %vm493_vm12, %vm495_vm10  ;;  %v520_v33 = vstv %s1691_s17 }
  0x9c   :  { %2011 = vmatpush3.bf16.msra.mxu0 %v2008_v31  ;;  %vm500_vm1 = vmand %vm2372_vm0, %vm2367_vm13  ;;  %v446_v31 = vadd.s32 8, %v2355_v13  ;;  %vm521_vm12 = vcmp.eq.s32.totalorder %v2279_v21, %v520_v33 }
  0x9d   :  { %2020 = vmatprep.subr.bf16.mxu0 %v2204_v8 }
  0x9e   :  { %vm508_vm8 = vcmp.eq.s32.totalorder %v446_v31, 8  ;;  %vm518_vm10 = vcmp.eq.s32.totalorder %v446_v31, 10  ;;  %vm529_vm14 = vcmp.eq.s32.totalorder %v446_v31, 12  ;;  %vm604_vm3 = vcmp.eq.s32.totalorder %v446_v31, 9 }
  0x9f   :  { %vm512_vm11 = vmand %vm508_vm8, %vm510_vm9  ;;  %vm589_vm8 = vcmp.eq.s32.totalorder %v2355_v13, 7 }
  0xa0   :  { %vm523_vm2 = vmand %vm518_vm10, %vm521_vm12  ;;  %vm625_vm12 = vcmp.eq.s32.totalorder %v446_v31, 13 }
  0xa1   :  { %vm532_vm13 = vmand %vm529_vm14, %vm530_vm15 }
  0xca   :  { %s2105_s23 = spop %2104 }
 0x16a   :  { %v1825_v34 = vpop.f32.mrb[0].mxu0 }
 0x16b   :  { %v139_v35 = vpop.f32.mrb[1].mxu0 }
 0x16c   :  { %1837 = vmatprep.mubr.msk.f32.mxu0 %vm167_vm5, %v139_v35 }
 0x16d   :  { %1838 = vmatmul.mubr.msk.f32.vlgmr.msra.gmra.mrb[4].mxu0 %vm167_vm5, %v1825_v34  ;;  %v502_v34 = vstv %s2099_s18 }
 0x16e   :  { %v1828_v36 = vpop.f32.mrb[2].mxu0 }
 0x16f   :  { %v149_v37 = vpop.f32.mrb[3].mxu0 }
 0x170   :  { %1840 = vmatprep.mubr.msk.f32.mxu0 %vm167_vm5, %v149_v37 }
 0x171   :  { %1841 = vmatmul.mubr.msk.f32.gmra.mrb[6].mxu0 %vm167_vm5, %v1828_v36  ;;  %v503_v36 = vsel %vm500_vm1, %v502_v34, 0.0  ;;  %v1685_v34 = vld [vmem:[%s2770_s2 + $0x142] ss:$0 sm:$0xff] }
 0x172   :  { %v505_v37 = vadd.f32 %v503_v36, %v491_v28 }
 0x240   :  { %v1839_v39 = vpop.f32.mrb[4].mxu0 }
 0x241   :  { %v252_v40 = vadd.f32 %v1839_v39, %v1679_v38  ;;  %v246_v41 = vpop.f32.mrb[5].mxu0  ;;  %v533_v39 = vstv %s2336_s28 }
 0x242   :  { %v247_v42 = vadd.f32 %v1679_v38, %v246_v41  ;;  %vm534_vm0 = vcmp.lt.s32.totalorder %v2279_v21, %v533_v39  ;;  %v537_v41 = vstv %s2101_s19 }
 0x243   :  { %v270_v43 = vsel %vm167_vm5, %v252_v40, 0.0  ;;  %vm536_vm1 = vmand %vm532_vm13, %vm534_vm0 }
 0x244   :  { %271 = vadd.xlane.f32.xlu1 %v270_v43  ;;  %v1842_v44 = vpop.f32.mrb[6].mxu0  ;;  %v267_v45 = vsel %vm167_vm5, %v247_v42, 0.0 }
 0x245   :  { %v256_v46 = vpop.f32.mrb[7].mxu0  ;;  %268 = vadd.xlane.f32.xlu0 %v267_v45  ;;  %v262_v48 = vadd.f32 %v1842_v44, %v1679_v38  ;;  %v570_v44 = vstv %s2340_s5  ;;  %v564_v45 = vsel %vm2392_vm7, 1.0, %v2203_v24 }
 0x246   :  { %v257_v47 = vadd.f32 %v1679_v38, %v256_v46  ;;  %v514_v38 = vsel %vm512_vm11, 1.0, %v2203_v24  ;;  %v539_v46 = vsel %vm536_vm1, %v537_v41, 0.0  ;;  %vm591_vm9 = vcmp.ge.s32.totalorder %v2385_v29, %v570_v44 }
 0x247   :  { %v276_v50 = vsel %vm167_vm5, %v262_v48, 0.0  ;;  %vm2418_vm10 = vmand %vm589_vm8, %vm591_vm9  ;;  %vm614_vm11 = vcmp.eq.s32.totalorder %v446_v31, 11  ;;  %vm568_vm1 = vcmp.eq.s32.totalorder %v2355_v13, 3  ;;  %v1684_v31 = vld [vmem:[%s2770_s2 + $0x141] ss:$0 sm:$0xff] }
 0x248   :  { %v273_v49 = vsel %vm167_vm5, %v257_v47, 0.0 }
 0x249   :  { %274 = vadd.xlane.f32.xlu0 %v273_v49  ;;  %v594_v49 = vstv %s2342_s6 }
 0x24a   :  { %vm2426_vm7 = vcmp.lt.s32.totalorder %v2385_v29, %v594_v49 }
 0x24b   :  { %vm596_vm15 = vmand %vm2418_vm10, %vm2426_vm7 }
 0x24d   :  { %277 = vadd.xlane.f32.xlu0 %v276_v50 }
 0x2d1   :  { %v272_v51 = vpop.xlane.xlu1 %271 }
 0x2d2   :  { %v281_v52 = vmul.f32 0.03125, %v272_v51  ;;  %v269_v53 = vpop.xlane.xlu0 %268  ;;  %v616_v51 = vstv %s1699_s20 }
 0x2d3   :  { %v280_v54 = vmul.f32 0.03125, %v269_v53  ;;  %v629_v53 = vstv %s2348_s10 }
 0x2d4   :  { %v2310_v55 = vsub.f32 %v252_v40, %v281_v52  ;;  %v525_v40 = vsel %vm523_vm2, 1.0, %v2203_v24  ;;  %vm617_vm2 = vcmp.eq.s32.totalorder %v2385_v29, %v616_v51  ;;  %vm630_vm0 = vcmp.lt.s32.totalorder %v2385_v29, %v629_v53 }
 0x2d5   :  { %v2312_v56 = vsub.f32 %v247_v42, %v280_v54  ;;  %v605_v42 = vstv %s2346_s8  ;;  %v527_v43 = vadd.f32 %v525_v40, %v514_v38  ;;  %v566_v54 = vadd.f32 %v564_v45, %v505_v37  ;;  %vm619_vm13 = vmand %vm614_vm11, %vm617_vm2  ;;  %s1663_s8 = sshll.u32 %s2207_s7, 4  ;;  %s1664_s8 = int_to_ptr.vmem [resolvable:$true] %s1663_s8 }
 0x2d6   :  { %v275_v57 = vpop.xlane.xlu0 %274  ;;  %v289_v58 = vmul.f32 %v2310_v55, %v2310_v55  ;;  %vm606_vm4 = vcmp.eq.s32.totalorder %v2385_v29, %v605_v42  ;;  %vm626_vm14 = vcmp.ge.s32.totalorder %v2385_v29, %v605_v42  ;;  %s2175_s9 = scalar_lea.vmem %s1664_s8, 32  ;;  %p2180_p6 = scmp.lt.s32.totalorder %s1664_s8, %s1664_s8 }
 0x2d7   :  { %v282_v59 = vmul.f32 0.03125, %v275_v57  ;;  %v288_v60 = vmul.f32 %v2312_v56, %v2312_v56  ;;  %vm608_vm6 = vmand %vm604_vm3, %vm606_vm4  ;;  %v541_v21 = vadd.f32 %v539_v46, %v527_v43  ;;  %vm2439_vm3 = vcmp.eq.s32.totalorder %v2385_v29, %v570_v44  ;;  %p2176_p5 = scmp.ne.s32.totalorder %s1664_s8, %s2175_s9  ;;  %p2181_p7 = scmp.lt.s32.totalorder %s2175_s9, %s2175_s9 }
 0x2d8   :  { %v295_v61 = vsel %vm167_vm5, %v289_v58, 0.0  ;;  %v621_v58 = vsel %vm619_vm13, 1.0, %v2203_v24  ;;  %vm628_vm4 = vmand %vm625_vm12, %vm626_vm14 }
 0x2d9   :  { %v2319_v62 = vsub.f32 %v257_v47, %v282_v59  ;;  %296 = vadd.xlane.f32.xlu0 %v295_v61  ;;  %v292_v63 = vsel %vm167_vm5, %v288_v60, 0.0  ;;  %v610_v47 = vsel %vm608_vm6, 1.0, %v2203_v24  ;;  %v633_v59 = vstv %s2105_s23  ;;  %vm632_vm8 = vmand %vm628_vm4, %vm630_vm0  ;;  %p2182_p8 = por %p2181_p7, %p2180_p6 }
 0x2da   :  { %293 = vadd.xlane.f32.xlu1 %v292_v63  ;;  %v278_v0 = vpop.xlane.xlu0 %277  ;;  %v612_v52 = vadd.f32 %v610_v47, %v541_v21  ;;  %vm578_vm6 = vcmp.eq.s32.totalorder %v2355_v13, 5  ;;  %v581_v60 = vstv %s1698_s22  ;;  %v598_v63 = vstv %s2423_s21  ;;  %vm572_vm11 = vmand %vm568_vm1, %vm2439_vm3 }
 0x2db   :  { %v283_v1 = vmul.f32 0.03125, %v278_v0  ;;  %v290_v2 = vmul.f32 %v2319_v62, %v2319_v62  ;;  %vm582_vm9 = vcmp.eq.s32.totalorder %v2385_v29, %v581_v60  ;;  %v635_v0 = vsel %vm632_vm8, %v633_v59, 0.0  ;;  %p2183_p9 = pnand %p2182_p8, %p2176_p5 }
 0x2dc   :  { %v623_v61 = vadd.f32 %v621_v58, %v612_v52  ;;  %vm583_vm2 = vmand %vm578_vm6, %vm582_vm9  ;;  %v599_v11 = vsel %vm596_vm15, %v598_v63, 0.0  ;;  %vm2206_vm15 = vmmov 0   ;;  %vm803_vm3 = vcmask 254976  }
 0x2dd   :  { %v2324_v3 = vsub.f32 %v262_v48, %v283_v1  ;;  %v298_v4 = vsel %vm167_vm5, %v290_v2, 0.0  ;;  %v574_v2 = vsel %vm572_vm11, 1.0, %v2203_v24  ;;  %v585_v7 = vsel %vm583_vm2, 1.0, %v2203_v24  ;;  %1862 = vmatprep.mubr.msk.f32.mxu0 %vm2206_vm15, %v2203_v24 }
 0x2de   :  { %299 = vadd.xlane.f32.xlu1 %v298_v4  ;;  %v2451_v1 = vadd.f32 %v635_v0, %v623_v61  ;;  %v719_v4 = vld [vmem:[%s2770_s2 + $0x60] sm:$0xff] }
 0x2df   :  { %v291_v5 = vmul.f32 %v2324_v3, %v2324_v3 }
 0x2e1   :  { %v301_v6 = vsel %vm167_vm5, %v291_v5, 0.0  ;;  %v720_v5 = vld [vmem:[%s2770_s2 + $0x68] sm:$0xff] }
 0x2e2   :  { %302 = vadd.xlane.f32.xlu0 %v301_v6  ;;  %v576_v6 = vadd.f32 %v574_v2, %v566_v54  ;;  %v2021_v9 = vpack.c.bf16 %v720_v5, %v719_v4 }
 0x2e4   :  { %v587_v13 = vadd.f32 %v585_v7, %v576_v6  ;;  %2022 = vmatpush3.bf16.msra.mxu0 %v2021_v9 }
 0x2e5   :  { %2023 = vmatprep.subr.bf16.mxu0 %v2204_v8 }
 0x2e6   :  { %v601_v15 = vadd.f32 %v599_v11, %v587_v13 }
 0x2e8   :  { %1851 = vmatprep.mubr.msk.f32.mxu1 %vm167_vm5, %v601_v15  ;;  %2025 = vmatpush3.bf16.msra.mxu0 %v2024_v14 }
 0x2e9   :  { %2032 = vmatprep.subr.bf16.mxu0 %v2204_v8 }
 0x366   :  { %v297_v16 = vpop.xlane.xlu0 %296 }
 0x367   :  { %v305_v17 = vmul.f32 0.03125, %v297_v16  ;;  %v294_v18 = vpop.xlane.xlu1 %293 }
 0x368   :  { %v304_v19 = vmul.f32 0.03125, %v294_v18 }
 0x369   :  { %v309_v20 = vadd.f32 1e-05, %v305_v17 }
 0x36a   :  { %v308_v22 = vadd.f32 1e-05, %v304_v19 }
 0x36b   :  { %2123 = vrsqrt.f32 %v309_v20  ;;  %v300_v23 = vpop.xlane.xlu1 %299 }
 0x36c   :  { %2125 = vrsqrt.f32 %v308_v22  ;;  %v306_v25 = vmul.f32 0.03125, %v300_v23 }
 0x36e   :  { %v310_v26 = vadd.f32 1e-05, %v306_v25 }
 0x36f   :  { %v303_v27 = vpop.xlane.xlu0 %302 }
 0x370   :  { %2127 = vrsqrt.f32 %v310_v26  ;;  %v307_v28 = vmul.f32 0.03125, %v303_v27 }
 0x372   :  { %v311_v29 = vadd.f32 1e-05, %v307_v28 }
 0x374   :  { %2129 = vrsqrt.f32 %v311_v29 }
 0x375   :  { %v2124_v30 = vpop.eup %2123 }
 0x376   :  { %v2126_v32 = vpop.eup %2125  ;;  %v317_v33 = vmul.f32 %v2124_v30, %v2310_v55 }
 0x377   :  { %v316_v35 = vmul.f32 %v2126_v32, %v2312_v56 }
 0x378   :  { %v325_v36 = vmul.f32 %v1684_v31, %v317_v33 }
 0x379   :  { %v324_v37 = vmul.f32 %v1684_v31, %v316_v35 }
 0x37a   :  { %v2128_v38 = vpop.eup %2127  ;;  %v2484_v39 = vadd.f32 %v1685_v34, %v325_v36 }
 0x37b   :  { %v318_v40 = vmul.f32 %v2128_v38, %v2319_v62  ;;  %v2487_v41 = vadd.f32 %v1685_v34, %v324_v37 }
 0x37c   :  { %v2490_v42 = vmul.f32 0.70710677, %v2484_v39 }
 0x37d   :  { %v2493_v55 = vmul.f32 0.70710677, %v2487_v41  ;;  %v326_v43 = vmul.f32 %v1684_v31, %v318_v40 }
 0x37e   :  { %v2130_v44 = vpop.eup %2129  ;;  %v353_v45 = vand.u32 2147483647, %v2490_v42  ;;  %vm345_vm10 = vcmp.ge.f32.partialorder %v2490_v42, 0.0 }
 0x37f   :  { %v319_v56 = vmul.f32 %v2130_v44, %v2324_v3  ;;  %v352_v46 = vand.u32 2147483647, %v2493_v55  ;;  %v2498_v47 = vadd.f32 %v1685_v34, %v326_v43  ;;  %vm344_vm7 = vcmp.ge.f32.partialorder %v2493_v55, 0.0 }
 0x380   :  { %v357_v21 = vmul.f32 0.3275911, %v353_v45  ;;  %v409_v60 = vsub.f32 0.0, %v353_v45 }
 0x381   :  { %v356_v62 = vmul.f32 0.3275911, %v352_v46  ;;  %v327_v48 = vmul.f32 %v1684_v31, %v319_v56  ;;  %v2501_v50 = vmul.f32 0.70710677, %v2498_v47  ;;  %v408_v61 = vsub.f32 0.0, %v352_v46 }
 0x382   :  { %v361_v49 = vadd.f32 1.0, %v357_v21  ;;  %v413_v2 = vmul.f32 %v409_v60, %v353_v45 }
 0x383   :  { %v360_v51 = vadd.f32 1.0, %v356_v62  ;;  %v2503_v52 = vadd.f32 %v1685_v34, %v327_v48  ;;  %v354_v53 = vand.u32 2147483647, %v2501_v50  ;;  %v412_v6 = vmul.f32 %v408_v61, %v352_v46 }
 0x384   :  { %2131 = vrcp.f32 %v361_v49  ;;  %v418_v12 = vmul.f32 1.442695, %v413_v2  ;;  %v2205_v61 = vmov -1.0   ;;  %vm346_vm12 = vcmp.ge.f32.partialorder %v2501_v50, 0.0 }
 0x385   :  { %2133 = vrcp.f32 %v360_v51  ;;  %v2507_v3 = vmul.f32 0.70710677, %v2503_v52  ;;  %v358_v54 = vmul.f32 0.3275911, %v354_v53  ;;  %v410_v9 = vsub.f32 0.0, %v354_v53 }
 0x386   :  { %v416_v14 = vmul.f32 1.442695, %v412_v6 }
 0x387   :  { %v355_v57 = vand.u32 2147483647, %v2507_v3  ;;  %v362_v58 = vadd.f32 1.0, %v358_v54  ;;  %v414_v18 = vmul.f32 %v410_v9, %v354_v53  ;;  %vm347_vm14 = vcmp.ge.f32.partialorder %v2507_v3, 0.0 }
 0x389   :  { %v359_v59 = vmul.f32 0.3275911, %v355_v57  ;;  %2135 = vrcp.f32 %v362_v58  ;;  %v411_v15 = vsub.f32 0.0, %v355_v57  ;;  %v420_v30 = vmul.f32 1.442695, %v414_v18 }
 0x38b   :  { %v363_v63 = vadd.f32 1.0, %v359_v59  ;;  %v415_v27 = vmul.f32 %v411_v15, %v355_v57 }
 0x38d   :  { %2137 = vrcp.f32 %v363_v63  ;;  %v422_v37 = vmul.f32 1.442695, %v415_v27  ;;  %v349_v63 = vsel %vm345_vm10, 1.0, %v2205_v61 }
 0x38e   :  { %v2132_v0 = vpop.eup %2131  ;;  %2139 = vpow2.f32 %v418_v12  ;;  %v336_v12 = vmul.f32 0.5, %v2487_v41  ;;  %v338_v41 = vmul.f32 0.5, %v2498_v47  ;;  %v860_v47 = vld [vmem:[%s2770_s2 + $0xb0] sm:$0xff] }
 0x38f   :  { %v2134_v4 = vpop.eup %2133  ;;  %v373_v5 = vmul.f32 1.0614054, %v2132_v0  ;;  %2141 = vpow2.f32 %v416_v14 }
 0x390   :  { %v372_v7 = vmul.f32 1.0614054, %v2134_v4  ;;  %2143 = vpow2.f32 %v420_v30 }
 0x391   :  { %v377_v10 = vadd.f32 -1.4531521, %v373_v5  ;;  %2145 = vpow2.f32 %v422_v37  ;;  %v348_v5 = vsel %vm344_vm7, 1.0, %v2205_v61  ;;  %v1009_v37 = vld [vmem:[%s2770_s2 + $0xc8] sm:$0xff] }
 0x392   :  { %v376_v11 = vadd.f32 -1.4531521, %v372_v7 }
 0x393   :  { %v381_v13 = vmul.f32 %v2132_v0, %v377_v10  ;;  %v2136_v16 = vpop.eup %2135  ;;  %v337_v10 = vmul.f32 0.5, %v2484_v39 }
 0x394   :  { %v380_v17 = vmul.f32 %v2134_v4, %v376_v11  ;;  %v374_v20 = vmul.f32 1.0614054, %v2136_v16 }
 0x395   :  { %v385_v19 = vadd.f32 1.4214138, %v381_v13 }
 0x396   :  { %v384_v22 = vadd.f32 1.4214138, %v380_v17  ;;  %v378_v26 = vadd.f32 -1.4531521, %v374_v20 }
 0x397   :  { %v2138_v23 = vpop.eup %2137  ;;  %v389_v25 = vmul.f32 %v2132_v0, %v385_v19 }
 0x398   :  { %v388_v28 = vmul.f32 %v2134_v4, %v384_v22  ;;  %v375_v29 = vmul.f32 1.0614054, %v2138_v23  ;;  %v382_v32 = vmul.f32 %v2136_v16, %v378_v26  ;;  %v2140_v62 = vpop.eup %2139  ;;  %v351_v26 = vsel %vm347_vm14, 1.0, %v2205_v61 }
 0x399   :  { %v393_v31 = vadd.f32 -0.28449672, %v389_v25  ;;  %v2142_v51 = vpop.eup %2141 }
 0x39a   :  { %v392_v33 = vadd.f32 -0.28449672, %v388_v28  ;;  %v379_v34 = vadd.f32 -1.4531521, %v375_v29  ;;  %v386_v36 = vadd.f32 1.4214138, %v382_v32  ;;  %v2144_v7 = vpop.eup %2143 }
 0x39b   :  { %v397_v35 = vmul.f32 %v2132_v0, %v393_v31  ;;  %v2146_v15 = vpop.eup %2145  ;;  %v858_v31 = vld [vmem:[%s2770_s2 + $0xa0] sm:$0xff]  ;;  %v859_v32 = vld [vmem:[%s2770_s2 + $0xa8] sm:$0xff] }
 0x39c   :  { %v396_v38 = vmul.f32 %v2134_v4, %v392_v33  ;;  %v383_v40 = vmul.f32 %v2138_v23, %v379_v34  ;;  %v390_v44 = vmul.f32 %v2136_v16, %v386_v36  ;;  %v2027_v33 = vpack.c.bf16 %v859_v32, %v858_v31  ;;  %v1008_v36 = vld [vmem:[%s2770_s2 + $0xc0] sm:$0xff] }
 0x39d   :  { %v401_v43 = vadd.f32 0.2548296, %v397_v35  ;;  %v855_v35 = vld [vmem:[%s2770_s2 + $0x88] sm:$0xff] }
 0x39e   :  { %v400_v45 = vadd.f32 0.2548296, %v396_v38  ;;  %v387_v56 = vadd.f32 1.4214138, %v383_v40  ;;  %v394_v21 = vadd.f32 -0.28449672, %v390_v44 }
 0x39f   :  { %v405_v46 = vmul.f32 %v2132_v0, %v401_v43  ;;  %v856_v43 = vld [vmem:[%s2770_s2 + $0x90] sm:$0xff]  ;;  %v857_v44 = vld [vmem:[%s2770_s2 + $0x98] sm:$0xff] }
 0x3a0   :  { %v404_v48 = vmul.f32 %v2134_v4, %v400_v45  ;;  %v391_v49 = vmul.f32 %v2138_v23, %v387_v56  ;;  %v398_v54 = vmul.f32 %v2136_v16, %v394_v21  ;;  %v2039_v56 = vpack.c.bf16 %v1009_v37, %v1008_v36  ;;  %v1010_v21 = vld [vmem:[%s2770_s2 + $0xd0] sm:$0xff] }
 0x3a1   :  { %v425_v53 = vmul.f32 %v2140_v62, %v405_v46  ;;  %v1011_v62 = vld [vmem:[%s2770_s2 + $0xd8] sm:$0xff] }
 0x3a2   :  { %v424_v57 = vmul.f32 %v2142_v51, %v404_v48  ;;  %v395_v58 = vadd.f32 -0.28449672, %v391_v49  ;;  %v402_v60 = vadd.f32 0.2548296, %v398_v54  ;;  %v2036_v48 = vpack.c.bf16 %v857_v44, %v856_v43  ;;  %v1086_v49 = vld [vmem:[%s2770_s2 + $0xe0] sm:$0xff]  ;;  %v1087_v51 = vld [vmem:[%s2770_s2 + $0xe8] sm:$0xff] }
 0x3a3   :  { %v429_v59 = vsub.f32 1.0, %v425_v53  ;;  %v2042_v53 = vpack.c.bf16 %v1011_v62, %v1010_v21  ;;  %v1164_v54 = vld [vmem:[%s2770_s2 + $0x100] sm:$0xff]  ;;  %v1379_v62 = vld [vmem:[%s2771_s3 + $0x8] sm:$0xff] }
 0x3a4   :  { %v428_v0 = vsub.f32 1.0, %v424_v57  ;;  %v399_v2 = vmul.f32 %v2138_v23, %v395_v58  ;;  %v406_v6 = vmul.f32 %v2136_v16, %v402_v60  ;;  %v350_v16 = vsel %vm346_vm12, 1.0, %v2205_v61  ;;  %v1165_v57 = vld [vmem:[%s2770_s2 + $0x108] sm:$0xff]  ;;  %v1088_v60 = vld [vmem:[%s2770_s2 + $0xf0] sm:$0xff]  ;;  %v1378_v21 = vld [vmem:[%s2771_s3] sm:$0xff] }
 0x3a5   :  { %v433_v4 = vmul.f32 %v429_v59, %v349_v63  ;;  %v2045_v58 = vpack.c.bf16 %v1087_v51, %v1086_v49  ;;  %v1089_v63 = vld [vmem:[%s2770_s2 + $0xf8] sm:$0xff]  ;;  %v2069_v49 = vpack.c.bf16 %v1379_v62, %v1378_v21 }
 0x3a6   :  { %v432_v9 = vmul.f32 %v428_v0, %v348_v5  ;;  %v403_v42 = vadd.f32 0.2548296, %v399_v2  ;;  %v426_v55 = vmul.f32 %v2144_v7, %v406_v6  ;;  %v2051_v0 = vpack.c.bf16 %v1165_v57, %v1164_v54  ;;  %v1166_v5 = vld [vmem:[%s2770_s2 + $0x110] sm:$0xff]  ;;  %v1242_v7 = vld [vmem:[%s2770_s2 + $0x120] sm:$0xff]  ;;  %v1381_v51 = vld [vmem:[%s2771_s3 + $0x18] sm:$0xff] }
 0x3a7   :  { %v437_v11 = vadd.f32 1.0, %v433_v4  ;;  %v1167_v4 = vld [vmem:[%s2770_s2 + $0x118] sm:$0xff]  ;;  %v2048_v6 = vpack.c.bf16 %v1089_v63, %v1088_v60  ;;  %v1382_v54 = vld [vmem:[%s2771_s3 + $0x20] sm:$0xff]  ;;  %v1383_v57 = vld [vmem:[%s2771_s3 + $0x28] sm:$0xff] }
 0x3a8   :  { %v436_v13 = vadd.f32 1.0, %v432_v9  ;;  %v407_v14 = vmul.f32 %v2138_v23, %v403_v42  ;;  %v430_v18 = vsub.f32 1.0, %v426_v55  ;;  %v339_v23 = vmul.f32 0.5, %v2503_v52  ;;  %v861_v52 = vld [vmem:[%s2770_s2 + $0xb8] sm:$0xff]  ;;  %v1243_v9 = vld [vmem:[%s2770_s2 + $0x128] sm:$0xff] }
 0x3a9   :  { %v441_v17 = vmul.f32 %v437_v11, %v337_v10  ;;  %v2030_v34 = vpack.c.bf16 %v861_v52, %v860_v47  ;;  %v2054_v42 = vpack.c.bf16 %v1167_v4, %v1166_v5  ;;  %v2057_v10 = vpack.c.bf16 %v1243_v9, %v1242_v7  ;;  %v1244_v11 = vld [vmem:[%s2770_s2 + $0x130] sm:$0xff]  ;;  %v1245_v55 = vld [vmem:[%s2770_s2 + $0x138] sm:$0xff]  ;;  %v1705_v9 = vld [vmem:[%s2770_s2 + $0x145] ss:$0 sm:$0xff] }
 0x3aa   :  { %v440_v19 = vmul.f32 %v436_v13, %v336_v12  ;;  %v427_v20 = vmul.f32 %v2146_v15, %v407_v14  ;;  %v434_v22 = vmul.f32 %v430_v18, %v350_v16  ;;  %v2060_v13 = vpack.c.bf16 %v1245_v55, %v1244_v11  ;;  %v1702_v15 = vld [vmem:[%s2770_s2 + $0x143] ss:$0 sm:$0xff]  ;;  %v1385_v60 = vld [vmem:[%s2771_s3 + $0x38] sm:$0xff] }
 0x3ac   :  { %v2012_v25 = vpack.c.bf16 %v441_v17, %v440_v19  ;;  %v431_v39 = vsub.f32 1.0, %v427_v20  ;;  %v438_v27 = vadd.f32 1.0, %v434_v22 }
 0x3ae   :  { %2013 = vmatprep.subr.bf16.mxu1 %v2012_v25  ;;  %v435_v50 = vmul.f32 %v431_v39, %v351_v26  ;;  %v442_v29 = vmul.f32 %v438_v27, %v338_v41 }
 0x3af   :  { %2015 = vmatpush3.bf16.msra.mxu1 %v2012_v25 }
 0x3b0   :  { %v439_v28 = vadd.f32 1.0, %v435_v50 }
 0x3b2   :  { %v443_v30 = vmul.f32 %v439_v28, %v339_v23 }
 0x3b4   :  { %v2016_v3 = vpack.c.bf16 %v443_v30, %v442_v29 }
 0x3b6   :  { %2017 = vmatprep.subr.bf16.mxu1 %v2016_v3 }
 0x3b7   :  { %2019 = vmatpush3.bf16.msra.mxu1 %v2016_v3 }
 0x3b8   :  { %2026 = vmatprep.subr.bf16.mxu1 %v2204_v8 }
 0x3ba   :  { %1852 = vmatmul.mubr.msk.f32.vlgmr.msra.gmra.mrb[0].mxu1 %vm167_vm5, %v2451_v1  ;;  %v854_v1 = vld [vmem:[%s2770_s2 + $0x80] sm:$0xff] }
 0x3bb   :  { %2028 = vmatpush3.bf16.msra.mxu1 %v2027_v33  ;;  %1873 = vmatprep.mubr.msk.f32.mxu1 %vm2206_vm15, %v2203_v24  ;;  %v2033_v38 = vpack.c.bf16 %v855_v35, %v854_v1  ;;  %v1712_v33 = vld [vmem:[%s2770_s2 + $0x146] ss:$0 sm:$0xff] }
 0x3bc   :  { %2029 = vmatprep.subr.bf16.mxu1 %v2204_v8 }
 0x3bf   :  { %2031 = vmatpush3.bf16.msra.mxu1 %v2030_v34 }
 0x3c0   :  { %2038 = vmatprep.subr.bf16.mxu1 %v2204_v8 }
 0x48d   :  { %v2555_v40 = vpop.f32.mrb[0].mxu1 }
 0x48e   :  { %v710_v45 = vpop.f32.mrb[1].mxu1  ;;  %v1168_v12 = vrot.slane %v2555_v40, 2  ;;  %v1246_v14 = vrot.slane %v2555_v40, 4 }
 0x48f   :  { %v862_v46 = vrot.slane %v710_v45, 4  ;;  %1863 = vmatmul.mubr.msk.f32.vlgmr.msra.gmra.mrb[8].mxu0 %vm167_vm5, %v710_v45  ;;  %v935_v59 = vrot.slane %v710_v45, 2  ;;  %v1012_v2 = vrot.slane %v710_v45, 6 }
 0x490   :  { %2034 = vmatpush3.bf16.msra.mxu0 %v2033_v38  ;;  %1884 = vmatprep.mubr.msk.f32.mxu0 %vm2206_vm15, %v2203_v24 }
 0x491   :  { %1874 = vmatmul.mubr.msk.f32.vlgmr.msra.gmra.mrb[2].mxu1 %vm167_vm5, %v862_v46  ;;  %2035 = vmatprep.subr.bf16.mxu0 %v2204_v8 }
 0x492   :  { %2040 = vmatpush3.bf16.msra.mxu1 %v2039_v56  ;;  %1895 = vmatprep.mubr.msk.f32.mxu1 %vm2206_vm15, %v2203_v24 }
 0x493   :  { %2041 = vmatprep.subr.bf16.mxu1 %v2204_v8 }
 0x494   :  { %2037 = vmatpush3.bf16.msra.mxu0 %v2036_v48  ;;  %v1380_v48 = vld [vmem:[%s2771_s3 + $0x10] sm:$0xff] }
 0x495   :  { %2044 = vmatprep.subr.bf16.mxu0 %v2204_v8 }
 0x496   :  { %2043 = vmatpush3.bf16.msra.mxu1 %v2042_v53  ;;  %v2072_v53 = vpack.c.bf16 %v1381_v51, %v1380_v48 }
 0x497   :  { %1885 = vmatmul.mubr.msk.f32.vlgmr.msra.gmra.mrb[10].mxu0 %vm167_vm5, %v935_v59  ;;  %2050 = vmatprep.subr.bf16.mxu1 %v2204_v8  ;;  %v2063_v59 = vpack.c.bf16 %v1383_v57, %v1382_v54 }
 0x498   :  { %2046 = vmatpush3.bf16.msra.mxu0 %v2045_v58  ;;  %1906 = vmatprep.mubr.msk.f32.mxu0 %vm2206_vm15, %v2203_v24  ;;  %v1384_v58 = vld [vmem:[%s2771_s3 + $0x30] sm:$0xff] }
 0x499   :  { %1896 = vmatmul.mubr.msk.f32.vlgmr.msra.gmra.mrb[4].mxu1 %vm167_vm5, %v1012_v2  ;;  %2047 = vmatprep.subr.bf16.mxu0 %v2204_v8  ;;  %v2066_v63 = vpack.c.bf16 %v1385_v60, %v1384_v58 }
 0x49a   :  { %2052 = vmatpush3.bf16.msra.mxu1 %v2051_v0  ;;  %1917 = vmatprep.mubr.msk.f32.mxu1 %vm2206_vm15, %v2203_v24 }
 0x49b   :  { %2053 = vmatprep.subr.bf16.mxu1 %v2204_v8 }
 0x49c   :  { %2049 = vmatpush3.bf16.msra.mxu0 %v2048_v6  ;;  %v1704_v6 = vld [vmem:[%s2770_s2 + $0x144] ss:$0 sm:$0xff] }
 0x49d   :  { %2056 = vmatprep.subr.bf16.mxu0 %v2204_v8 }
 0x49e   :  { %2055 = vmatpush3.bf16.msra.mxu1 %v2054_v42 }
 0x49f   :  { %1907 = vmatmul.mubr.msk.f32.vlgmr.msra.gmra.mrb[12].mxu0 %vm167_vm5, %v2555_v40  ;;  %2062 = vmatprep.subr.bf16.mxu1 %v2204_v8 }
 0x4a0   :  { %2058 = vmatpush3.bf16.msra.mxu0 %v2057_v10  ;;  %1928 = vmatprep.mubr.msk.f32.mxu0 %vm2206_vm15, %v2203_v24 }
 0x4a1   :  { %1918 = vmatmul.mubr.msk.f32.vlgmr.msra.gmra.mrb[6].mxu1 %vm167_vm5, %v1168_v12  ;;  %2059 = vmatprep.subr.bf16.mxu0 %v2204_v8 }
 0x4a2   :  { %1939 = vmatprep.mubr.msk.f32.mxu1 %vm2206_vm15, %v2203_v24  ;;  %2064 = vmatpush3.bf16.msra.mxu1 %v2063_v59 }
 0x4a3   :  { %2065 = vmatprep.subr.bf16.mxu1 %v2204_v8 }
 0x4a4   :  { %2061 = vmatpush3.bf16.msra.mxu0 %v2060_v13 }
 0x4a5   :  { %2068 = vmatprep.subr.bf16.mxu0 %v2204_v8 }
 0x4a6   :  { %2067 = vmatpush3.bf16.msra.mxu1 %v2066_v63 }
 0x4a7   :  { %1929 = vmatmul.mubr.msk.f32.vlgmr.msra.gmra.mrb[14].mxu0 %vm167_vm5, %v1246_v14  ;;  %2074 = vmatprep.subr.bf16.mxu1 %v2204_v8 }
 0x4a8   :  { %1950 = vmatprep.mubr.msk.f32.mxu0 %vm2206_vm15, %v2203_v24  ;;  %2070 = vmatpush3.bf16.msra.mxu0 %v2069_v49 }
 0x4a9   :  { %2071 = vmatprep.subr.bf16.mxu0 %v2204_v8 }
 0x4ac   :  { %2073 = vmatpush3.bf16.msra.mxu0 %v2072_v53 }
 0x562   :  { %v797_v17 = vpop.f32.mrb[8].mxu0 }
 0x563   :  { %v798_v18 = vadd.f32 %v1702_v15, %v797_v17  ;;  %v1864_v19 = vpop.f32.mrb[9].mxu0 }
 0x564   :  { %v931_v16 = vpop.f32.mrb[2].mxu1 }
 0x565   :  { %v1875_v20 = vpop.f32.mrb[3].mxu1  ;;  %v804_v22 = vsel %vm803_vm3, %v798_v18, 0.0 }
 0x566   :  { %805 = vadd.xlane.f32.xlu1 %v804_v22  ;;  %v1713_v22 = vld [vmem:[%s2770_s2 + $0x147] ss:$0 sm:$0xff] }
 0x56a   :  { %v1004_v25 = vpop.f32.mrb[10].mxu0 }
 0x56b   :  { %v1005_v39 = vadd.f32 %v1004_v25, %v931_v16  ;;  %v1886_v26 = vpop.f32.mrb[11].mxu0 }
 0x56c   :  { %v1081_v50 = vpop.f32.mrb[4].mxu1  ;;  %v1714_v26 = vld [vmem:[%s2770_s2 + $0x148] ss:$0 sm:$0xff] }
 0x56d   :  { %v1085_v27 = vadd.f32 %v1081_v50, %v1005_v39  ;;  %v1897_v41 = vpop.f32.mrb[5].mxu1 }
 0x572   :  { %v1159_v23 = vpop.f32.mrb[12].mxu0 }
 0x573   :  { %v1163_v28 = vadd.f32 %v1159_v23, %v1085_v27  ;;  %v1908_v29 = vpop.f32.mrb[13].mxu0 }
 0x574   :  { %v1237_v30 = vpop.f32.mrb[6].mxu1 }
 0x575   :  { %v1241_v3 = vadd.f32 %v1237_v30, %v1163_v28  ;;  %v1919_v31 = vpop.f32.mrb[7].mxu1 }
 0x57a   :  { %v1315_v32 = vpop.f32.mrb[14].mxu0 }
 0x57b   :  { %v1319_v47 = vadd.f32 %v1315_v32, %v1241_v3  ;;  %v1930_v52 = vpop.f32.mrb[15].mxu0 }
 0x57d   :  { %v1325_v34 = vadd.f32 %v1712_v33, %v1319_v47 }
 0x57f   :  { %v1328_v1 = vsel %vm803_vm3, %v1325_v34, 0.0 }
 0x580   :  { %1329 = vadd.xlane.f32.xlu0 %v1328_v1 }
 0x5f3   :  { %v806_v35 = vpop.xlane.xlu1 %805 }
 0x5f4   :  { %v807_v36 = vmul.f32 0.03125, %v806_v35 }
 0x5f6   :  { %v808_v37 = vsub.f32 %v798_v18, %v807_v36 }
 0x5f8   :  { %v809_v38 = vmul.f32 %v808_v37, %v808_v37 }
 0x5fa   :  { %v810_v40 = vsel %vm803_vm3, %v809_v38, 0.0 }
 0x5fb   :  { %811 = vadd.xlane.f32.xlu1 %v810_v40 }
 0x60d   :  { %v1330_v43 = vpop.xlane.xlu0 %1329 }
 0x60e   :  { %v1331_v44 = vmul.f32 0.03125, %v1330_v43 }
 0x610   :  { %v1332_v45 = vsub.f32 %v1325_v34, %v1331_v44 }
 0x612   :  { %v1333_v56 = vmul.f32 %v1332_v45, %v1332_v45 }
 0x614   :  { %v1334_v46 = vsel %vm803_vm3, %v1333_v56, 0.0 }
 0x615   :  { %1335 = vadd.xlane.f32.xlu0 %v1334_v46 }
 0x688   :  { %v812_v0 = vpop.xlane.xlu1 %811 }
 0x689   :  { %v813_v2 = vmul.f32 0.03125, %v812_v0 }
 0x68b   :  { %v814_v5 = vadd.f32 1e-05, %v813_v2 }
 0x68d   :  { %2147 = vrsqrt.f32 %v814_v5 }
 0x697   :  { %v2148_v4 = vpop.eup %2147 }
 0x698   :  { %v816_v7 = vmul.f32 %v2148_v4, %v808_v37 }
 0x69a   :  { %v821_v42 = vmul.f32 %v1704_v6, %v816_v7 }
 0x69c   :  { %v826_v10 = vadd.f32 %v1705_v9, %v821_v42  ;;  %v1565_v42 = vld [vmem:[%s2771_s3 + $0x41] sm:$0xff] }
 0x69e   :  { %v828_v11 = vmul.f32 0.70710677, %v826_v10  ;;  %v827_v44 = vmul.f32 0.5, %v826_v10  ;;  %v1566_v10 = vld [vmem:[%s2771_s3 + $0x49] sm:$0xff] }
 0x6a0   :  { %v831_v55 = vand.u32 2147483647, %v828_v11  ;;  %vm829_vm13 = vcmp.ge.f32.partialorder %v828_v11, 0.0  ;;  %v2075_v11 = vpack.c.bf16 %v1566_v10, %v1565_v42 }
 0x6a1   :  { %v830_v40 = vsel %vm829_vm13, 1.0, %v2205_v61 }
 0x6a2   :  { %v832_v12 = vmul.f32 0.3275911, %v831_v55  ;;  %v1336_v13 = vpop.xlane.xlu0 %1335  ;;  %v845_v18 = vsub.f32 0.0, %v831_v55 }
 0x6a3   :  { %v1337_v14 = vmul.f32 0.03125, %v1336_v13  ;;  %v1569_v13 = vld [vmem:[%s2771_s3 + $0x61] sm:$0xff] }
 0x6a4   :  { %v833_v15 = vadd.f32 1.0, %v832_v12  ;;  %v846_v16 = vmul.f32 %v845_v18, %v831_v55  ;;  %v1567_v55 = vld [vmem:[%s2771_s3 + $0x51] sm:$0xff]  ;;  %v1572_v18 = vld [vmem:[%s2771_s3 + $0x79] sm:$0xff] }
 0x6a5   :  { %v1338_v17 = vadd.f32 1e-05, %v1337_v14  ;;  %v1570_v14 = vld [vmem:[%s2771_s3 + $0x69] sm:$0xff] }
 0x6a6   :  { %2149 = vrcp.f32 %v833_v15  ;;  %v847_v27 = vmul.f32 1.442695, %v846_v16  ;;  %v2081_v15 = vpack.c.bf16 %v1570_v14, %v1569_v13  ;;  %v1573_v16 = vld [vmem:[%s2771_s3 + $0x81] sm:$0xff] }
 0x6a7   :  { %2151 = vrsqrt.f32 %v1338_v17  ;;  %v1571_v17 = vld [vmem:[%s2771_s3 + $0x71] sm:$0xff] }
 0x6a8   :  { %2153 = vpow2.f32 %v847_v27  ;;  %v1578_v27 = vld [vmem:[%s2771_s3 + $0xa9] sm:$0xff] }
 0x6b0   :  { %v2150_v19 = vpop.eup %2149 }
 0x6b1   :  { %v2152_v20 = vpop.eup %2151  ;;  %v836_v25 = vmul.f32 1.0614054, %v2150_v19 }
 0x6b2   :  { %v1340_v39 = vmul.f32 %v2152_v20, %v1332_v45  ;;  %v2154_v35 = vpop.eup %2153  ;;  %v1574_v20 = vld [vmem:[%s2771_s3 + $0x89] sm:$0xff] }
 0x6b3   :  { %v837_v50 = vadd.f32 -1.4531521, %v836_v25  ;;  %v1575_v25 = vld [vmem:[%s2771_s3 + $0x91] sm:$0xff] }
 0x6b4   :  { %v1345_v41 = vmul.f32 %v1713_v22, %v1340_v39  ;;  %v2087_v22 = vpack.c.bf16 %v1574_v20, %v1573_v16  ;;  %v1576_v39 = vld [vmem:[%s2771_s3 + $0x99] sm:$0xff] }
 0x6b5   :  { %v838_v23 = vmul.f32 %v2150_v19, %v837_v50  ;;  %v1577_v50 = vld [vmem:[%s2771_s3 + $0xa1] sm:$0xff] }
 0x6b6   :  { %v1350_v28 = vadd.f32 %v1714_v26, %v1345_v41  ;;  %v2090_v26 = vpack.c.bf16 %v1576_v39, %v1575_v25  ;;  %v2093_v41 = vpack.c.bf16 %v1578_v27, %v1577_v50 }
 0x6b7   :  { %v839_v29 = vadd.f32 1.4214138, %v838_v23  ;;  %v1579_v23 = vld [vmem:[%s2771_s3 + $0xb1] sm:$0xff] }
 0x6b8   :  { %v1352_v30 = vmul.f32 0.70710677, %v1350_v28  ;;  %v1351_v6 = vmul.f32 0.5, %v1350_v28  ;;  %v1580_v28 = vld [vmem:[%s2771_s3 + $0xb9] sm:$0xff] }
 0x6b9   :  { %v840_v3 = vmul.f32 %v2150_v19, %v839_v29  ;;  %v2096_v29 = vpack.c.bf16 %v1580_v28, %v1579_v23 }
 0x6ba   :  { %v1355_v31 = vand.u32 2147483647, %v1352_v30  ;;  %vm1353_vm0 = vcmp.ge.f32.partialorder %v1352_v30, 0.0 }
 0x6bb   :  { %v841_v32 = vadd.f32 -0.28449672, %v840_v3  ;;  %v1354_v5 = vsel %vm1353_vm0, 1.0, %v2205_v61 }
 0x6bc   :  { %v1356_v33 = vmul.f32 0.3275911, %v1355_v31  ;;  %v1369_v38 = vsub.f32 0.0, %v1355_v31 }
 0x6bd   :  { %v842_v47 = vmul.f32 %v2150_v19, %v841_v32  ;;  %v1717_v32 = vld [vmem:[%s2771_s3 + $0x40] ss:$0 sm:$0xff] }
 0x6be   :  { %v1357_v52 = vadd.f32 1.0, %v1356_v33  ;;  %v1370_v46 = vmul.f32 %v1369_v38, %v1355_v31 }
 0x6bf   :  { %v843_v34 = vadd.f32 0.2548296, %v842_v47 }
 0x6c0   :  { %2155 = vrcp.f32 %v1357_v52  ;;  %v1371_v49 = vmul.f32 1.442695, %v1370_v46 }
 0x6c1   :  { %v844_v1 = vmul.f32 %v2150_v19, %v843_v34  ;;  %v2084_v19 = vpack.c.bf16 %v1572_v18, %v1571_v17 }
 0x6c2   :  { %2157 = vpow2.f32 %v1371_v49 }
 0x6c3   :  { %v849_v36 = vmul.f32 %v2154_v35, %v844_v1 }
 0x6c5   :  { %v850_v37 = vsub.f32 1.0, %v849_v36 }
 0x6c7   :  { %v851_v43 = vmul.f32 %v850_v37, %v830_v40 }
 0x6c9   :  { %v852_v45 = vadd.f32 1.0, %v851_v43 }
 0x6ca   :  { %v2156_v56 = vpop.eup %2155 }
 0x6cb   :  { %v853_v21 = vmul.f32 %v852_v45, %v827_v44  ;;  %v1360_v62 = vmul.f32 1.0614054, %v2156_v56 }
 0x6cc   :  { %v2158_v63 = vpop.eup %2157 }
 0x6cd   :  { %1951 = vmatmul.mubr.msk.f32.vlgmr.msra.gmra.mrb[16].mxu0 %vm167_vm5, %v853_v21  ;;  %v1361_v48 = vadd.f32 -1.4531521, %v1360_v62 }
 0x6cf   :  { %v1362_v51 = vmul.f32 %v2156_v56, %v1361_v48 }
 0x6d1   :  { %v1363_v53 = vadd.f32 1.4214138, %v1362_v51 }
 0x6d3   :  { %v1364_v54 = vmul.f32 %v2156_v56, %v1363_v53 }
 0x6d5   :  { %v1365_v57 = vadd.f32 -0.28449672, %v1364_v54 }
 0x6d7   :  { %v1366_v58 = vmul.f32 %v2156_v56, %v1365_v57 }
 0x6d9   :  { %v1367_v59 = vadd.f32 0.2548296, %v1366_v58 }
 0x6db   :  { %v1368_v60 = vmul.f32 %v2156_v56, %v1367_v59 }
 0x6dd   :  { %v1373_v0 = vmul.f32 %v2158_v63, %v1368_v60 }
 0x6df   :  { %v1374_v2 = vsub.f32 1.0, %v1373_v0  ;;  %v1718_v0 = vld [vmem:[%s2771_s3 + $0xc1] ss:$0 sm:$0xff] }
 0x6e1   :  { %v1375_v4 = vmul.f32 %v1374_v2, %v1354_v5 }
 0x6e3   :  { %v1376_v7 = vadd.f32 1.0, %v1375_v4 }
 0x6e5   :  { %v1377_v9 = vmul.f32 %v1376_v7, %v1351_v6 }
 0x6e7   :  { %1940 = vmatmul.mubr.msk.f32.vlgmr.msra.gmra.mrb[8].mxu1 %vm167_vm5, %v1377_v9 }
 0x6e8   :  { %1985 = vmatprep.mubr.msk.f32.mxu1 %vm2206_vm15, %v2203_v24  ;;  %2076 = vmatpush3.bf16.msra.mxu1 %v2075_v11  ;;  %v1568_v24 = vld [vmem:[%s2771_s3 + $0x59] sm:$0xff] }
 0x6e9   :  { %2077 = vmatprep.subr.bf16.mxu1 %v2204_v8  ;;  %v2078_v12 = vpack.c.bf16 %v1568_v24, %v1567_v55 }
 0x6ec   :  { %2079 = vmatpush3.bf16.msra.mxu1 %v2078_v12 }
 0x6ed   :  { %2080 = vmatprep.subr.bf16.mxu1 %v2204_v8 }
 0x6f0   :  { %2082 = vmatpush3.bf16.msra.mxu1 %v2081_v15 }
 0x6f1   :  { %2083 = vmatprep.subr.bf16.mxu1 %v2204_v8 }
 0x6f4   :  { %2085 = vmatpush3.bf16.msra.mxu1 %v2084_v19 }
 0x6f5   :  { %2086 = vmatprep.subr.bf16.mxu1 %v2204_v8 }
 0x6f8   :  { %2088 = vmatpush3.bf16.msra.mxu1 %v2087_v22 }
 0x6f9   :  { %2089 = vmatprep.subr.bf16.mxu1 %v2204_v8 }
 0x6fc   :  { %2091 = vmatpush3.bf16.msra.mxu1 %v2090_v26 }
 0x6fd   :  { %2092 = vmatprep.subr.bf16.mxu1 %v2204_v8 }
 0x700   :  { %2094 = vmatpush3.bf16.msra.mxu1 %v2093_v41 }
 0x701   :  { %2095 = vmatprep.subr.bf16.mxu1 %v2204_v8 }
 0x704   :  { %2097 = vmatpush3.bf16.msra.mxu1 %v2096_v29 }
 0x7a0   :  { %v1528_v30 = vpop.f32.mrb[16].mxu0 }
 0x7a1   :  { %v1952_v3 = vpop.f32.mrb[17].mxu0 }
 0x7ba   :  { %v1455_v31 = vpop.f32.mrb[8].mxu1 }
 0x7bb   :  { %v1529_v33 = vadd.f32 %v1528_v30, %v1455_v31  ;;  %v1941_v47 = vpop.f32.mrb[9].mxu1 }
 0x7bd   :  { %v1537_v8 = vadd.f32 %v1717_v32, %v1529_v33 }
 0x7bf   :  { %v1539_v52 = vmul.f32 0.70710677, %v1537_v8  ;;  %v1538_v59 = vmul.f32 0.5, %v1537_v8 }
 0x7c1   :  { %v1542_v34 = vand.u32 2147483647, %v1539_v52  ;;  %vm1540_vm5 = vcmp.ge.f32.partialorder %v1539_v52, 0.0 }
 0x7c2   :  { %v1541_v57 = vsel %vm1540_vm5, 1.0, %v2205_v61 }
 0x7c3   :  { %v1543_v1 = vmul.f32 0.3275911, %v1542_v34  ;;  %v1556_v36 = vsub.f32 0.0, %v1542_v34 }
 0x7c5   :  { %v1544_v35 = vadd.f32 1.0, %v1543_v1  ;;  %v1557_v38 = vmul.f32 %v1556_v36, %v1542_v34 }
 0x7c7   :  { %2159 = vrcp.f32 %v1544_v35  ;;  %v1558_v44 = vmul.f32 1.442695, %v1557_v38 }
 0x7c9   :  { %2161 = vpow2.f32 %v1558_v44 }
 0x7d1   :  { %v2160_v37 = vpop.eup %2159 }
 0x7d2   :  { %v1547_v40 = vmul.f32 1.0614054, %v2160_v37 }
 0x7d3   :  { %v2162_v51 = vpop.eup %2161 }
 0x7d4   :  { %v1548_v43 = vadd.f32 -1.4531521, %v1547_v40 }
 0x7d6   :  { %v1549_v45 = vmul.f32 %v2160_v37, %v1548_v43 }
 0x7d8   :  { %v1550_v56 = vadd.f32 1.4214138, %v1549_v45 }
 0x7da   :  { %v1551_v46 = vmul.f32 %v2160_v37, %v1550_v56 }
 0x7dc   :  { %v1552_v21 = vadd.f32 -0.28449672, %v1551_v46 }
 0x7de   :  { %v1553_v62 = vmul.f32 %v2160_v37, %v1552_v21 }
 0x7e0   :  { %v1554_v48 = vadd.f32 0.2548296, %v1553_v62 }
 0x7e2   :  { %v1555_v49 = vmul.f32 %v2160_v37, %v1554_v48 }
 0x7e4   :  { %v1560_v53 = vmul.f32 %v2162_v51, %v1555_v49 }
 0x7e6   :  { %v1561_v54 = vsub.f32 1.0, %v1560_v53 }
 0x7e8   :  { %v1562_v58 = vmul.f32 %v1561_v54, %v1541_v57 }
 0x7ea   :  { %v1563_v60 = vadd.f32 1.0, %v1562_v58 }
 0x7ec   :  { %v1564_v63 = vmul.f32 %v1563_v60, %v1538_v59 }
 0x7ee   :  { %1986 = vmatmul.mubr.f32.vlgmr.msra.gmra.mrb[10].mxu1 %v1564_v63 }
 0x8c1   :  { %v1652_v2 = vpop.f32.mrb[10].mxu1 }
 0x8c2   :  { %v1653_v5 = vadd.f32 %v1718_v0, %v1652_v2  ;;  %v1987_v4 = vpop.f32.mrb[11].mxu1 }
 0x8c4   :  { %1656 = vst [vmem:[#allocation4] sm:$0x3] %v1653_v5 }
 0x8c5   :  { %2186 = shalt.err (!%p2183_p9)
}
 0x8c6   :  { %s2187_s12 = scalar_lea.hbm %s2772_s4, 32 }
 0x8c7   :  { %p2188_p10 = scmp.ne.s32.totalorder %s2772_s4, %s2187_s12  ;;  %p2191_p11 = scmp.lt.u32.totalorder %s2187_s12, %s2772_s4 }
 0x8c9   :  { %p2193_p12 = pnand %p2191_p11, %p2188_p10 }
 0x8cb   :  { %2196 = shalt.err (!%p2193_p12)
}
 0x8cc   :  { %1666 = dma.vmem_to_hbm [thread:$0]  %s1664_s8, 32, %s2772_s4, [#allocation5]  }
 0x8cd   :  { %2199 = dma.done.wait [#allocation5], 32  }
 0x8ce   :  { %2200 = vsyncadd [#allocation5], 4294967264 }
 0x8cf   :  { %1670 = vsyncpa [#allocation5], 1 }

</bundles_post_ra>
